<compile_context>
chip_gen: v7x
topology: tpu7x:2x2x1
jax: 0.10.0
libtpu: 0.0.40
codegen_flags: <defaults>
</compile_context>

<pallas_src>
import jax
import jax.numpy as jnp
from jax import lax
from jax.experimental import pallas as pl
from jax.experimental.pallas import tpu as pltpu

EPS = 1e-5  # nn.BatchNorm2d default eps


# ----------------------------- Pallas kernels ------------------------------

def conv_bn_relu_kernel(pt_ref, wt_ref, gb_ref, o_ref):
    """Fused conv (as matmul on im2col^T) + batch-stat BN + ReLU.

    pt_ref: (K, M)     bf16   im2col patches, transposed (M = N*Ho*Wo on lanes)
    wt_ref: (Cout, K)  bf16   conv weights, K ordered (kh, kw, cin)
    gb_ref: (Cout, 2)  f32    column 0 = gamma, column 1 = beta
    o_ref : (Cout, M)  bf16
    """
    y = jnp.dot(wt_ref[...], pt_ref[...],
                preferred_element_type=jnp.float32)          # (Cout, M) f32
    m = y.shape[-1]
    inv_m = 1.0 / m
    mean = jnp.sum(y, axis=-1, keepdims=True) * inv_m         # (Cout, 1)
    msq = jnp.sum(y * y, axis=-1, keepdims=True) * inv_m      # E[y^2]
    var = msq - mean * mean                                   # biased variance
    gamma = gb_ref[:, 0:1]
    beta = gb_ref[:, 1:2]
    scale = gamma * lax.rsqrt(var + EPS)                      # (Cout, 1)
    shift = beta - mean * scale
    o_ref[...] = jnp.maximum(y * scale + shift, 0.0).astype(o_ref.dtype)


def head_kernel(x_ref, w_ref, b_ref, o_ref):
    o_ref[...] = (
        jnp.dot(x_ref[...], w_ref[...], preferred_element_type=jnp.float32)
        + b_ref[...]
    )


def _vmem_specs(n):
    return [pl.BlockSpec(memory_space=pltpu.MemorySpace.VMEM) for _ in range(n)]


def conv_bn_relu(pt, wt, gb):
    cout = wt.shape[0]
    m = pt.shape[1]
    return pl.pallas_call(
        conv_bn_relu_kernel,
        out_shape=jax.ShapeDtypeStruct((cout, m), jnp.bfloat16),
        in_specs=_vmem_specs(3),
        out_specs=pl.BlockSpec(memory_space=pltpu.MemorySpace.VMEM),
    )(pt, wt, gb)


def head(x, w, b):
    return pl.pallas_call(
        head_kernel,
        out_shape=jax.ShapeDtypeStruct((x.shape[0], w.shape[1]), jnp.float32),
        in_specs=_vmem_specs(3),
        out_specs=pl.BlockSpec(memory_space=pltpu.MemorySpace.VMEM),
    )(x, w, b)


# ------------------------------- JAX glue ----------------------------------

def conv2d_size_out(size, kernel_size=5, stride=2):
    return (size - (kernel_size - 1) - 1) // stride + 1


def im2col_t(x, k=5, s=2):
    """x: (C, N, H, W) -> patches^T of shape (k*k*C, N*Ho*Wo).

    K index order is (kh, kw, c); M index order is (n, ho, wo).
    """
    C, N, H, W = x.shape
    Ho = (H - k) // s + 1
    Wo = (W - k) // s + 1
    cols = []
    for kh in range(k):
        for kw in range(k):
            cols.append(x[:, :, kh:kh + s * Ho:s, kw:kw + s * Wo:s])
    p = jnp.stack(cols, axis=0)                   # (k*k, C, N, Ho, Wo)
    return p.reshape(k * k * C, N * Ho * Wo), Ho, Wo


def init_params(key, h, w, n_actions):
    """Deterministic synthetic parameters (same shapes as the PyTorch module).

    Conv biases are intentionally absent: they cancel under batch-stat BN.
    """
    layer_dims = [(4, 16), (16, 32), (32, 32)]
    params = {}
    keys = jax.random.split(key, 3 * len(layer_dims) + 2)
    ki = 0
    for i, (cin, cout) in enumerate(layer_dims, start=1):
        wk = 0.05 * jax.random.normal(keys[ki], (5, 5, cin, cout), jnp.float32)
        ki += 1
        # (Cout, K) with K ordered (kh, kw, cin) to match im2col_t.
        params[f"w{i}"] = jnp.transpose(wk, (3, 0, 1, 2)).reshape(
            cout, 5 * 5 * cin).astype(jnp.bfloat16)
        g = 1.0 + 0.1 * jax.random.normal(keys[ki], (cout,), jnp.float32); ki += 1
        bt = 0.05 * jax.random.normal(keys[ki], (cout,), jnp.float32); ki += 1
        params[f"gb{i}"] = jnp.stack([g, bt], axis=1)          # (Cout, 2)

    convw = conv2d_size_out(conv2d_size_out(conv2d_size_out(w)))
    convh = conv2d_size_out(conv2d_size_out(conv2d_size_out(h)))
    linear_input_size = convw * convh * 32
    # Head weight is in PyTorch's flattened-NCHW (c, h, w) input order.
    params["wh"] = (0.05 * jax.random.normal(
        keys[ki], (linear_input_size, n_actions), jnp.float32)).astype(jnp.bfloat16)
    ki += 1
    params["bh"] = 0.01 * jax.random.normal(keys[ki], (1, n_actions), jnp.float32)
    return params


@jax.jit
def dqn_forward(params, x_nchw):
    """x_nchw: (N, 4, h, w) -> Q-values (N, n_actions)."""
    n = x_nchw.shape[0]
    # Channel-major activations (C, N, H, W); bf16 for the MXU matmuls.
    x = jnp.transpose(x_nchw, (1, 0, 2, 3)).astype(jnp.bfloat16)
    for i in (1, 2, 3):
        pt, ho, wo = im2col_t(x, k=5, s=2)
        cout = params[f"w{i}"].shape[0]
        yt = conv_bn_relu(pt, params[f"w{i}"], params[f"gb{i}"])   # (Cout, M)
        x = yt.reshape(cout, n, ho, wo)
    # PyTorch flattens NCHW: x.view(N, -1) -> (c, h, w) order per sample.
    feat = jnp.transpose(x, (1, 0, 2, 3)).reshape(n, -1)           # (N, C*H*W)
    return head(feat, params["wh"], params["bh"])


if __name__ == "__main__":
    batch, channels, h, w = 2, 4, 40, 40
    n_actions = 4

    key = jax.random.PRNGKey(0)
    kx, kp = jax.random.split(key)
    x = jax.random.normal(kx, (batch, channels, h, w), jnp.float32)
    params = init_params(kp, h, w, n_actions)

    q = dqn_forward(params, x)
    jax.block_until_ready(q)
    assert q.shape == (batch, n_actions), q.shape
    print("KERNEL_OK")
</pallas_src>

<mosaic_0001>
module attributes {stable_mosaic.version = 11 : i64} {
  func.func @conv_bn_relu_kernel(%arg0: memref<100x648xbf16, #tpu.memory_space<vmem>>, %arg1: memref<16x100xbf16, #tpu.memory_space<vmem>>, %arg2: memref<16x2xf32, #tpu.memory_space<vmem>>, %arg3: memref<16x648xbf16, #tpu.memory_space<vmem>>) attributes {dimension_semantics = [], scalar_prefetch = 0 : i64, scratch_operands = 0 : i64, tpu.core_type = #tpu.core_type<tc>} {
    %c0 = arith.constant 0 : index
    %c0_0 = arith.constant 0 : index
    %0 = vector.load %arg1[%c0, %c0_0] : memref<16x100xbf16, #tpu.memory_space<vmem>>, vector<16x100xbf16>
    %c0_1 = arith.constant 0 : index
    %c0_2 = arith.constant 0 : index
    %1 = vector.load %arg0[%c0_1, %c0_2] : memref<100x648xbf16, #tpu.memory_space<vmem>>, vector<100x648xbf16>
    %cst = arith.constant dense<0.000000e+00> : vector<16x648xf32>
    %2 = tpu.matmul %0, %1, %cst {dimension_numbers = #tpu.dot_dimension_numbers<[1], [0], [0], [1], [0, 0, 1, 1], [], []>} : vector<16x100xbf16>, vector<100x648xbf16>, vector<16x648xf32> -> vector<16x648xf32>
    %cst_3 = arith.constant dense<0.000000e+00> : vector<16xf32>
    %3 = vector.multi_reduction <add>, %2, %cst_3 [1] : vector<16x648xf32> to vector<16xf32>
    %4 = vector.shape_cast %3 : vector<16xf32> to vector<16x1xf32>
    %cst_4 = arith.constant 0.00154320989 : f32
    %5 = vector.broadcast %cst_4 : f32 to vector<16x1xf32>
    %6 = arith.mulf %4, %5 : vector<16x1xf32>
    %7 = arith.mulf %2, %2 : vector<16x648xf32>
    %cst_5 = arith.constant dense<0.000000e+00> : vector<16xf32>
    %8 = vector.multi_reduction <add>, %7, %cst_5 [1] : vector<16x648xf32> to vector<16xf32>
    %9 = vector.shape_cast %8 : vector<16xf32> to vector<16x1xf32>
    %cst_6 = arith.constant 0.00154320989 : f32
    %10 = vector.broadcast %cst_6 : f32 to vector<16x1xf32>
    %11 = arith.mulf %9, %10 : vector<16x1xf32>
    %12 = arith.mulf %6, %6 : vector<16x1xf32>
    %13 = arith.subf %11, %12 : vector<16x1xf32>
    %c0_7 = arith.constant 0 : index
    %c0_8 = arith.constant 0 : index
    %14 = vector.load %arg2[%c0_7, %c0_8] : memref<16x2xf32, #tpu.memory_space<vmem>>, vector<16x1xf32>
    %c0_9 = arith.constant 0 : index
    %c1 = arith.constant 1 : index
    %15 = vector.load %arg2[%c0_9, %c1] : memref<16x2xf32, #tpu.memory_space<vmem>>, vector<16x1xf32>
    %cst_10 = arith.constant 9.99999974E-6 : f32
    %16 = vector.broadcast %cst_10 : f32 to vector<16x1xf32>
    %17 = arith.addf %13, %16 : vector<16x1xf32>
    %18 = math.rsqrt %17 : vector<16x1xf32>
    %19 = arith.mulf %14, %18 : vector<16x1xf32>
    %20 = arith.mulf %6, %19 : vector<16x1xf32>
    %21 = arith.subf %15, %20 : vector<16x1xf32>
    %22 = vector.broadcast %19 : vector<16x1xf32> to vector<16x648xf32>
    %23 = arith.mulf %2, %22 : vector<16x648xf32>
    %24 = vector.broadcast %21 : vector<16x1xf32> to vector<16x648xf32>
    %25 = arith.addf %23, %24 : vector<16x648xf32>
    %cst_11 = arith.constant 0.000000e+00 : f32
    %26 = vector.broadcast %cst_11 : f32 to vector<16x648xf32>
    %27 = arith.maximumf %25, %26 : vector<16x648xf32>
    %28 = arith.truncf %27 : vector<16x648xf32> to vector<16x648xbf16>
    %c0_12 = arith.constant 0 : index
    %c0_13 = arith.constant 0 : index
    %29 = vector.load %arg3[%c0_12, %c0_13] : memref<16x648xbf16, #tpu.memory_space<vmem>>, vector<16x648xbf16>
    tpu.vector_store %arg3[%c0_12, %c0_13], %28 {strides = array<i32>} : memref<16x648xbf16, #tpu.memory_space<vmem>>, vector<16x648xbf16>,
    return
  }
}

module attributes {stable_mosaic.version = 11 : i64} {
  func.func @conv_bn_relu_kernel(%arg0: memref<400x98xbf16, #tpu.memory_space<vmem>>, %arg1: memref<32x400xbf16, #tpu.memory_space<vmem>>, %arg2: memref<32x2xf32, #tpu.memory_space<vmem>>, %arg3: memref<32x98xbf16, #tpu.memory_space<vmem>>) attributes {dimension_semantics = [], scalar_prefetch = 0 : i64, scratch_operands = 0 : i64, tpu.core_type = #tpu.core_type<tc>} {
    %c0 = arith.constant 0 : index
    %c0_0 = arith.constant 0 : index
    %0 = vector.load %arg1[%c0, %c0_0] : memref<32x400xbf16, #tpu.memory_space<vmem>>, vector<32x400xbf16>
    %c0_1 = arith.constant 0 : index
    %c0_2 = arith.constant 0 : index
    %1 = vector.load %arg0[%c0_1, %c0_2] : memref<400x98xbf16, #tpu.memory_space<vmem>>, vector<400x98xbf16>
    %cst = arith.constant dense<0.000000e+00> : vector<32x98xf32>
    %2 = tpu.matmul %0, %1, %cst {dimension_numbers = #tpu.dot_dimension_numbers<[1], [0], [0], [1], [0, 0, 1, 1], [], []>} : vector<32x400xbf16>, vector<400x98xbf16>, vector<32x98xf32> -> vector<32x98xf32>
    %cst_3 = arith.constant dense<0.000000e+00> : vector<32xf32>
    %3 = vector.multi_reduction <add>, %2, %cst_3 [1] : vector<32x98xf32> to vector<32xf32>
    %4 = vector.shape_cast %3 : vector<32xf32> to vector<32x1xf32>
    %cst_4 = arith.constant 0.0102040814 : f32
    %5 = vector.broadcast %cst_4 : f32 to vector<32x1xf32>
    %6 = arith.mulf %4, %5 : vector<32x1xf32>
    %7 = arith.mulf %2, %2 : vector<32x98xf32>
    %cst_5 = arith.constant dense<0.000000e+00> : vector<32xf32>
    %8 = vector.multi_reduction <add>, %7, %cst_5 [1] : vector<32x98xf32> to vector<32xf32>
    %9 = vector.shape_cast %8 : vector<32xf32> to vector<32x1xf32>
    %cst_6 = arith.constant 0.0102040814 : f32
    %10 = vector.broadcast %cst_6 : f32 to vector<32x1xf32>
    %11 = arith.mulf %9, %10 : vector<32x1xf32>
    %12 = arith.mulf %6, %6 : vector<32x1xf32>
    %13 = arith.subf %11, %12 : vector<32x1xf32>
    %c0_7 = arith.constant 0 : index
    %c0_8 = arith.constant 0 : index
    %14 = vector.load %arg2[%c0_7, %c0_8] : memref<32x2xf32, #tpu.memory_space<vmem>>, vector<32x1xf32>
    %c0_9 = arith.constant 0 : index
    %c1 = arith.constant 1 : index
    %15 = vector.load %arg2[%c0_9, %c1] : memref<32x2xf32, #tpu.memory_space<vmem>>, vector<32x1xf32>
    %cst_10 = arith.constant 9.99999974E-6 : f32
    %16 = vector.broadcast %cst_10 : f32 to vector<32x1xf32>
    %17 = arith.addf %13, %16 : vector<32x1xf32>
    %18 = math.rsqrt %17 : vector<32x1xf32>
    %19 = arith.mulf %14, %18 : vector<32x1xf32>
    %20 = arith.mulf %6, %19 : vector<32x1xf32>
    %21 = arith.subf %15, %20 : vector<32x1xf32>
    %22 = vector.broadcast %19 : vector<32x1xf32> to vector<32x98xf32>
    %23 = arith.mulf %2, %22 : vector<32x98xf32>
    %24 = vector.broadcast %21 : vector<32x1xf32> to vector<32x98xf32>
    %25 = arith.addf %23, %24 : vector<32x98xf32>
    %cst_11 = arith.constant 0.000000e+00 : f32
    %26 = vector.broadcast %cst_11 : f32 to vector<32x98xf32>
    %27 = arith.maximumf %25, %26 : vector<32x98xf32>
    %28 = arith.truncf %27 : vector<32x98xf32> to vector<32x98xbf16>
    %c0_12 = arith.constant 0 : index
    %c0_13 = arith.constant 0 : index
    %29 = vector.load %arg3[%c0_12, %c0_13] : memref<32x98xbf16, #tpu.memory_space<vmem>>, vector<32x98xbf16>
    tpu.vector_store %arg3[%c0_12, %c0_13], %28 {strides = array<i32>} : memref<32x98xbf16, #tpu.memory_space<vmem>>, vector<32x98xbf16>,
    return
  }
}

module attributes {stable_mosaic.version = 11 : i64} {
  func.func @conv_bn_relu_kernel(%arg0: memref<800x8xbf16, #tpu.memory_space<vmem>>, %arg1: memref<32x800xbf16, #tpu.memory_space<vmem>>, %arg2: memref<32x2xf32, #tpu.memory_space<vmem>>, %arg3: memref<32x8xbf16, #tpu.memory_space<vmem>>) attributes {dimension_semantics = [], scalar_prefetch = 0 : i64, scratch_operands = 0 : i64, tpu.core_type = #tpu.core_type<tc>} {
    %c0 = arith.constant 0 : index
    %c0_0 = arith.constant 0 : index
    %0 = vector.load %arg1[%c0, %c0_0] : memref<32x800xbf16, #tpu.memory_space<vmem>>, vector<32x800xbf16>
    %c0_1 = arith.constant 0 : index
    %c0_2 = arith.constant 0 : index
    %1 = vector.load %arg0[%c0_1, %c0_2] : memref<800x8xbf16, #tpu.memory_space<vmem>>, vector<800x8xbf16>
    %cst = arith.constant dense<0.000000e+00> : vector<32x8xf32>
    %2 = tpu.matmul %0, %1, %cst {dimension_numbers = #tpu.dot_dimension_numbers<[1], [0], [0], [1], [0, 0, 1, 1], [], []>} : vector<32x800xbf16>, vector<800x8xbf16>, vector<32x8xf32> -> vector<32x8xf32>
    %cst_3 = arith.constant dense<0.000000e+00> : vector<32xf32>
    %3 = vector.multi_reduction <add>, %2, %cst_3 [1] : vector<32x8xf32> to vector<32xf32>
    %4 = vector.shape_cast %3 : vector<32xf32> to vector<32x1xf32>
    %cst_4 = arith.constant 1.250000e-01 : f32
    %5 = vector.broadcast %cst_4 : f32 to vector<32x1xf32>
    %6 = arith.mulf %4, %5 : vector<32x1xf32>
    %7 = arith.mulf %2, %2 : vector<32x8xf32>
    %cst_5 = arith.constant dense<0.000000e+00> : vector<32xf32>
    %8 = vector.multi_reduction <add>, %7, %cst_5 [1] : vector<32x8xf32> to vector<32xf32>
    %9 = vector.shape_cast %8 : vector<32xf32> to vector<32x1xf32>
    %cst_6 = arith.constant 1.250000e-01 : f32
    %10 = vector.broadcast %cst_6 : f32 to vector<32x1xf32>
    %11 = arith.mulf %9, %10 : vector<32x1xf32>
    %12 = arith.mulf %6, %6 : vector<32x1xf32>
    %13 = arith.subf %11, %12 : vector<32x1xf32>
    %c0_7 = arith.constant 0 : index
    %c0_8 = arith.constant 0 : index
    %14 = vector.load %arg2[%c0_7, %c0_8] : memref<32x2xf32, #tpu.memory_space<vmem>>, vector<32x1xf32>
    %c0_9 = arith.constant 0 : index
    %c1 = arith.constant 1 : index
    %15 = vector.load %arg2[%c0_9, %c1] : memref<32x2xf32, #tpu.memory_space<vmem>>, vector<32x1xf32>
    %cst_10 = arith.constant 9.99999974E-6 : f32
    %16 = vector.broadcast %cst_10 : f32 to vector<32x1xf32>
    %17 = arith.addf %13, %16 : vector<32x1xf32>
    %18 = math.rsqrt %17 : vector<32x1xf32>
    %19 = arith.mulf %14, %18 : vector<32x1xf32>
    %20 = arith.mulf %6, %19 : vector<32x1xf32>
    %21 = arith.subf %15, %20 : vector<32x1xf32>
    %22 = vector.broadcast %19 : vector<32x1xf32> to vector<32x8xf32>
    %23 = arith.mulf %2, %22 : vector<32x8xf32>
    %24 = vector.broadcast %21 : vector<32x1xf32> to vector<32x8xf32>
    %25 = arith.addf %23, %24 : vector<32x8xf32>
    %cst_11 = arith.constant 0.000000e+00 : f32
    %26 = vector.broadcast %cst_11 : f32 to vector<32x8xf32>
    %27 = arith.maximumf %25, %26 : vector<32x8xf32>
    %28 = arith.truncf %27 : vector<32x8xf32> to vector<32x8xbf16>
    %c0_12 = arith.constant 0 : index
    %c0_13 = arith.constant 0 : index
    %29 = vector.load %arg3[%c0_12, %c0_13] : memref<32x8xbf16, #tpu.memory_space<vmem>>, vector<32x8xbf16>
    tpu.vector_store %arg3[%c0_12, %c0_13], %28 {strides = array<i32>} : memref<32x8xbf16, #tpu.memory_space<vmem>>, vector<32x8xbf16>,
    return
  }
}

module attributes {stable_mosaic.version = 11 : i64} {
  func.func @head_kernel(%arg0: memref<2x128xbf16, #tpu.memory_space<vmem>>, %arg1: memref<128x4xbf16, #tpu.memory_space<vmem>>, %arg2: memref<1x4xf32, #tpu.memory_space<vmem>>, %arg3: memref<2x4xf32, #tpu.memory_space<vmem>>) attributes {dimension_semantics = [], scalar_prefetch = 0 : i64, scratch_operands = 0 : i64, tpu.core_type = #tpu.core_type<tc>} {
    %c0 = arith.constant 0 : index
    %c0_0 = arith.constant 0 : index
    %0 = vector.load %arg0[%c0, %c0_0] : memref<2x128xbf16, #tpu.memory_space<vmem>>, vector<2x128xbf16>
    %c0_1 = arith.constant 0 : index
    %c0_2 = arith.constant 0 : index
    %1 = vector.load %arg1[%c0_1, %c0_2] : memref<128x4xbf16, #tpu.memory_space<vmem>>, vector<128x4xbf16>
    %cst = arith.constant dense<0.000000e+00> : vector<2x4xf32>
    %2 = tpu.matmul %0, %1, %cst {dimension_numbers = #tpu.dot_dimension_numbers<[1], [0], [0], [1], [0, 0, 1, 1], [], []>} : vector<2x128xbf16>, vector<128x4xbf16>, vector<2x4xf32> -> vector<2x4xf32>
    %c0_3 = arith.constant 0 : index
    %c0_4 = arith.constant 0 : index
    %3 = vector.load %arg2[%c0_3, %c0_4] : memref<1x4xf32, #tpu.memory_space<vmem>>, vector<1x4xf32>
    %4 = vector.broadcast %3 : vector<1x4xf32> to vector<2x4xf32>
    %5 = arith.addf %2, %4 : vector<2x4xf32>
    %c0_5 = arith.constant 0 : index
    %c0_6 = arith.constant 0 : index
    %6 = vector.load %arg3[%c0_5, %c0_6] : memref<2x4xf32, #tpu.memory_space<vmem>>, vector<2x4xf32>
    tpu.vector_store %arg3[%c0_5, %c0_6], %5 {strides = array<i32>} : memref<2x4xf32, #tpu.memory_space<vmem>>, vector<2x4xf32>,
    return
  }
}

</mosaic_0001>

<bundles_post_ra>
// kernel: dqn_forward.4
= control target key start
LH: loop header
LB: loop body
LE: loop exit
PB: predicated region body
PF: predicated region fallthrough
CT: control target
= control target key end

     0   :  { %v718_v1 = vmov 0   ;;  %vm260_vm0 = vcmask 1041408   ;;  %vm256_vm1 = vcmask 818176   ;;  %vm412_vm2 = vcmask 64512   ;;  %s720_s13 = smov 1   ;;  %s984_s0 = inlined_call_operand.vmem [shape: bf16[100,648], index: 0, kind: input, shape index: {}]   ;;  %s985_s1 = inlined_call_operand.vmem [shape: bf16[16,100], index: 1, kind: input, shape index: {}]   ;;  %s986_s2 = inlined_call_operand.vmem [shape: f32[16,2], index: 2, kind: input, shape index: {}]   ;;  %s987_s3 = inlined_call_operand.vmem [shape: bf16[16,648], index: 3, kind: output, shape index: {}]  }
   0x1   :  { %v653_v0 = vld [vmem:[%s984_s0 + $0x4] ss:$24 sps:$4 sm:$0xff]   ;;  %311 = vmatprep.mubr.bf16.mxu0 %v718_v1  ;;  %354 = vmatprep.mubr.bf16.mxu1 %v718_v1  ;;  %v655_v2 = vld [vmem:[%s984_s0] ss:$24 sps:$4 sm:$0xff]   ;;  %v658_v4 = vld [vmem:[%s984_s0 + $0x34] ss:$24 sps:$4 sm:$0xff]  }
   0x2   :  { %650 = vset.pattern.permute.xlu1 %v718_v1  ;;  %279 = vmatprep.subr.bf16.mxu0 %v653_v0  ;;  %v656_v3 = vld [vmem:[%s984_s0 + $0xc] ss:$24 sps:$4 sm:$0xff]   ;;  %v660_v5 = vld [vmem:[%s984_s0 + $0x8] ss:$24 sps:$4 sm:$0xff]   ;;  %v662_v7 = vld [vmem:[%s984_s0 + $0x3c] ss:$24 sps:$4 sm:$0xff]  }
   0x3   :  { %280 = vmatpush1.bf16.msra.mxu0 %v655_v2  ;;  %v661_v6 = vld [vmem:[%s984_s0 + $0x30] ss:$24 sps:$4 sm:$0xff]   ;;  %322 = vmatprep.subr.bf16.mxu1 %v656_v3  ;;  %v664_v8 = vld [vmem:[%s984_s0 + $0x64] ss:$24 sps:$4 sm:$0xff]   ;;  %v667_v10 = vld [vmem:[%s984_s0 + $0x60] ss:$24 sps:$4 sm:$0xff]  }
   0x4   :  { %281 = vmatprep.subr.bf16.mxu0 %v658_v4  ;;  %323 = vmatpush1.bf16.msra.mxu1 %v660_v5  ;;  %v666_v9 = vld [vmem:[%s984_s0 + $0x38] ss:$24 sps:$4 sm:$0xff]   ;;  %v668_v11 = vld [vmem:[%s984_s0 + $0x6c] ss:$24 sps:$4 sm:$0xff]   ;;  %v672_v13 = vld [vmem:[%s984_s0 + $0x68] ss:$24 sps:$4 sm:$0xff]  }
   0x5   :  { %324 = vmatprep.subr.bf16.mxu1 %v662_v7  ;;  %v670_v12 = vld [vmem:[%s984_s0 + $0x94] ss:$24 sps:$4 sm:$0xff]   ;;  %v673_v15 = vld [vmem:[%s984_s0 + $0x90] ss:$24 sps:$4 sm:$0xff]   ;;  %v676_v16 = vld [vmem:[%s984_s0 + $0xc4] ss:$24 sps:$4 sm:$0xff]  }
   0x6   :  { %v674_v14 = vld [vmem:[%s984_s0 + $0x9c] ss:$24 sps:$4 sm:$0xff]   ;;  %v678_v17 = vld [vmem:[%s984_s0 + $0x98] ss:$24 sps:$4 sm:$0xff]   ;;  %v680_v18 = vld [vmem:[%s984_s0 + $0xcc] ss:$24 sps:$4 sm:$0xff]  }
   0x7   :  { %282 = vmatpush1.bf16.msra.mxu0 %v661_v6  ;;  %v679_v19 = vld [vmem:[%s984_s0 + $0xc0] ss:$24 sps:$4 sm:$0xff]   ;;  %v682_v20 = vld [vmem:[%s984_s0 + $0xf4] ss:$24 sps:$4 sm:$0xff]   ;;  %v685_v23 = vld [vmem:[%s984_s0 + $0xf0] ss:$24 sps:$4 sm:$0xff]  }
   0x8   :  { %283 = vmatprep.subr.bf16.mxu0 %v664_v8  ;;  %325 = vmatpush1.bf16.msra.mxu1 %v666_v9  ;;  %v684_v21 = vld [vmem:[%s984_s0 + $0xc8] ss:$24 sps:$4 sm:$0xff]   ;;  %v686_v24 = vld [vmem:[%s984_s0 + $0xfc] ss:$24 sps:$4 sm:$0xff]   ;;  %v689_v28 = vld [vmem:[%s984_s0 + $0xf8] ss:$24 sps:$4 sm:$0xff]  }
   0x9   :  { %326 = vmatprep.subr.bf16.mxu1 %v668_v11  ;;  %v53_v22 = vld [vmem:[%s984_s0 + $0x120] sm:$0x33]  ;;  %v54_v25 = vld [vmem:[%s984_s0 + $0x128] sm:$0x33]  ;;  %v55_v45 = vld [vmem:[%s984_s0 + $0x130] sm:$0x33] }
   0xa   :  { %v624_v26 = vcombine.high %v53_v22, %v53_v22  ;;  %v623_v27 = vcombine.low %v53_v22, %v53_v22  ;;  %v626_v29 = vcombine.high %v54_v25, %v54_v25  ;;  %v625_v30 = vcombine.low %v54_v25, %v54_v25  ;;  %v696_v32 = vld [vmem:[%s984_s0 + $0x14] ss:$24 sps:$4 sm:$0xff]   ;;  %v692_v33 = vld [vmem:[%s985_s1] sm:$0xff]   ;;  %v694_v35 = vld [vmem:[%s984_s0 + $0x10] ss:$24 sps:$4 sm:$0xff]  }
   0xb   :  { %284 = vmatpush1.bf16.msra.mxu0 %v667_v10  ;;  %v699_v36 = vld [vmem:[%s984_s0 + $0x44] ss:$24 sps:$4 sm:$0xff]   ;;  %v697_v37 = vld [vmem:[%s984_s0 + $0x40] ss:$24 sps:$4 sm:$0xff]   ;;  %v702_v38 = vld [vmem:[%s984_s0 + $0x74] ss:$24 sps:$4 sm:$0xff]   ;;  %v628_v47 = vcombine.high %v55_v45, %v55_v45  ;;  %v627_v48 = vcombine.low %v55_v45, %v55_v45 }
   0xc   :  { %285 = vmatprep.subr.bf16.mxu0 %v670_v12  ;;  %327 = vmatpush1.bf16.msra.mxu1 %v672_v13  ;;  %v262_v31 = vsel %vm260_vm0, %v623_v27, 0  ;;  %v268_v34 = vsel %vm260_vm0, %v625_v30, 0  ;;  %v700_v39 = vld [vmem:[%s984_s0 + $0x70] ss:$24 sps:$4 sm:$0xff]   ;;  %v705_v40 = vld [vmem:[%s984_s0 + $0xa4] ss:$24 sps:$4 sm:$0xff]  }
   0xd   :  { %328 = vmatprep.subr.bf16.mxu1 %v674_v14  ;;  %v703_v41 = vld [vmem:[%s984_s0 + $0xa0] ss:$24 sps:$4 sm:$0xff]   ;;  %v708_v42 = vld [vmem:[%s984_s0 + $0xd4] ss:$24 sps:$4 sm:$0xff]   ;;  %v706_v43 = vld [vmem:[%s984_s0 + $0xd0] ss:$24 sps:$4 sm:$0xff]  }
   0xe   :  { %v711_v44 = vld [vmem:[%s984_s0 + $0x104] ss:$24 sps:$4 sm:$0xff]   ;;  %v709_v46 = vld [vmem:[%s984_s0 + $0x100] ss:$24 sps:$4 sm:$0xff]   ;;  %v274_v49 = vsel %vm260_vm0, %v627_v48, 0  ;;  %v719_v48 = vmov 1  }
   0xf   :  { %286 = vmatpush1.bf16.msra.mxu0 %v673_v15  ;;  %651 = vset.pattern.permute.xlu0 %v719_v48  ;;  %vm575_vm3 = vcmask 1043456   ;;  %vm576_vm4 = vcmask 64516  }
  0x10   :  { %287 = vmatprep.subr.bf16.mxu0 %v676_v16  ;;  %329 = vmatpush1.bf16.msra.mxu1 %v678_v17  ;;  %vm958_vm5 = vmor %vm576_vm4, %vm575_vm3 }
  0x11   :  { %330 = vmatprep.subr.bf16.mxu1 %v680_v18 }
  0x13   :  { %288 = vmatpush1.bf16.msra.mxu0 %v679_v19 }
  0x14   :  { %289 = vmatprep.subr.bf16.mxu0 %v682_v20  ;;  %331 = vmatpush1.bf16.msra.mxu1 %v684_v21 }
  0x15   :  { %332 = vmatprep.subr.bf16.mxu1 %v686_v24 }
  0x17   :  { %290 = vmatpush1.bf16.msra.mxu0 %v685_v23 }
  0x18   :  { %629 = vmatprep.subr.msk.bf16.mxu0 %vm260_vm0, %v624_v26  ;;  %333 = vmatpush1.bf16.msra.mxu1 %v689_v28 }
  0x19   :  { %631 = vmatprep.subr.msk.bf16.mxu1 %vm260_vm0, %v626_v29 }
  0x1b   :  { %292 = vmatpush1.bf16.msra.mxu0 %v262_v31 }
  0x1c   :  { %365 = vmatprep.subr.bf16.mxu0 %v696_v32  ;;  %335 = vmatpush1.bf16.msra.mxu1 %v268_v34 }
  0x1e   :  { %630 = vmatmul.mubr.msk.bf16.vlgmr.msra.gmra.mrb[0].mxu0 %vm256_vm1, %v692_v33 }
  0x1f   :  { %366 = vmatpush1.bf16.msra.mxu0 %v694_v35  ;;  %397 = vmatprep.mubr.bf16.mxu0 %v718_v1 }
  0x20   :  { %632 = vmatmul.mubr.msk.bf16.vlgmr.msra.gmra.mrb[0].mxu1 %vm256_vm1, %v692_v33  ;;  %367 = vmatprep.subr.bf16.mxu0 %v699_v36 }
  0x23   :  { %368 = vmatpush1.bf16.msra.mxu0 %v697_v37 }
  0x24   :  { %369 = vmatprep.subr.bf16.mxu0 %v702_v38 }
  0x27   :  { %370 = vmatpush1.bf16.msra.mxu0 %v700_v39 }
  0x28   :  { %371 = vmatprep.subr.bf16.mxu0 %v705_v40 }
  0x2b   :  { %372 = vmatpush1.bf16.msra.mxu0 %v703_v41 }
  0x2c   :  { %373 = vmatprep.subr.bf16.mxu0 %v708_v42 }
  0x2f   :  { %374 = vmatpush1.bf16.msra.mxu0 %v706_v43 }
  0x30   :  { %375 = vmatprep.subr.bf16.mxu0 %v711_v44 }
  0x33   :  { %376 = vmatpush1.bf16.msra.mxu0 %v709_v46 }
  0x34   :  { %633 = vmatprep.subr.msk.bf16.mxu0 %vm260_vm0, %v628_v47 }
  0x37   :  { %378 = vmatpush1.bf16.msra.mxu0 %v274_v49  ;;  %v461_v49 = vld [vmem:[%s986_s2] sm:$0xff] }
  0x3a   :  { %634 = vmatmul.mubr.msk.bf16.vlgmr.msra.gmra.mrb[4].mxu0 %vm256_vm1, %v692_v33 }
  0xf1   :  { %v874_v50 = vpop.f32.mrb[0].mxu0 }
  0xf2   :  { %v427_v51 = vmul.f32 %v874_v50, %v874_v50  ;;  %v878_v52 = vpop.f32.mrb[1].mxu0 }
  0xf3   :  { %v408_v53 = vadd.f32 %v878_v52, %v874_v50  ;;  %v428_v54 = vmul.f32 %v878_v52, %v878_v52  ;;  %v884_v55 = vpop.f32.mrb[2].mxu0  ;;  %v886_v56 = vpop.f32.mrb[0].mxu1 }
  0xf4   :  { %v433_v57 = vmul.f32 %v884_v55, %v884_v55  ;;  %v890_v58 = vpop.f32.mrb[3].mxu0  ;;  %v429_v59 = vmul.f32 %v886_v56, %v886_v56  ;;  %v894_v60 = vpop.f32.mrb[1].mxu1 }
  0xf5   :  { %v439_v61 = vadd.f32 %v428_v54, %v427_v51  ;;  %v417_v62 = vadd.f32 %v890_v58, %v884_v55  ;;  %v434_v63 = vmul.f32 %v890_v58, %v890_v58  ;;  %v409_v0 = vadd.f32 %v408_v53, %v886_v56  ;;  %v901_v1 = vpop.f32.mrb[2].mxu1  ;;  %v462_v54 = vld [vmem:[%s986_s2 + $0x8] sm:$0xff] }
  0xf6   :  { %v430_v2 = vmul.f32 %v894_v60, %v894_v60  ;;  %v435_v3 = vmul.f32 %v901_v1, %v901_v1  ;;  %v907_v4 = vpop.f32.mrb[3].mxu1 }
  0xf7   :  { %v447_v5 = vadd.f32 %v434_v63, %v433_v57  ;;  %v440_v6 = vadd.f32 %v439_v61, %v429_v59  ;;  %v410_v7 = vadd.f32 %v409_v0, %v894_v60  ;;  %v418_v8 = vadd.f32 %v417_v62, %v901_v1 }
  0xf8   :  { %v436_v9 = vmul.f32 %v907_v4, %v907_v4 }
  0xf9   :  { %v448_v10 = vadd.f32 %v447_v5, %v435_v3  ;;  %v419_v11 = vadd.f32 %v418_v8, %v907_v4  ;;  %v441_v12 = vadd.f32 %v440_v6, %v430_v2 }
  0xfb   :  { %v449_v13 = vadd.f32 %v448_v10, %v436_v9 }
 0x10d   :  { %v914_v14 = vpop.f32.mrb[4].mxu0 }
 0x10e   :  { %v431_v15 = vmul.f32 %v914_v14, %v914_v14  ;;  %v918_v16 = vpop.f32.mrb[5].mxu0  ;;  %v411_v17 = vadd.f32 %v410_v7, %v914_v14 }
 0x10f   :  { %v921_v18 = vpop.f32.mrb[6].mxu0  ;;  %v413_v19 = vsel %vm412_vm2, %v918_v16, 0.0  ;;  %v432_v20 = vmul.f32 %v918_v16, %v918_v16 }
 0x110   :  { %v437_v21 = vmul.f32 %v921_v18, %v921_v18  ;;  %v929_v22 = vpop.f32.mrb[7].mxu0  ;;  %v414_v23 = vadd.f32 %v413_v19, %v411_v17  ;;  %v442_v24 = vadd.f32 %v441_v12, %v431_v15  ;;  %v420_v25 = vadd.f32 %v419_v11, %v921_v18 }
 0x111   :  { %v421_v26 = vsel %vm412_vm2, %v929_v22, 0.0  ;;  %v438_v27 = vmul.f32 %v929_v22, %v929_v22  ;;  %v443_v28 = vsel %vm412_vm2, %v432_v20, 0.0 }
 0x112   :  { %415 = vadd.xlane.f32.xlu0 %v414_v23  ;;  %v444_v29 = vadd.f32 %v443_v28, %v442_v24  ;;  %v422_v30 = vadd.f32 %v421_v26, %v420_v25  ;;  %v450_v31 = vadd.f32 %v449_v13, %v437_v21 }
 0x113   :  { %v451_v32 = vsel %vm412_vm2, %v438_v27, 0.0 }
 0x114   :  { %445 = vadd.xlane.f32.xlu1 %v444_v29  ;;  %v452_v33 = vadd.f32 %v451_v32, %v450_v31 }
 0x116   :  { %423 = vadd.xlane.f32.xlu0 %v422_v30 }
 0x118   :  { %453 = vadd.xlane.f32.xlu1 %v452_v33 }
 0x19f   :  { %v416_v34 = vpop.xlane.xlu0 %415 }
 0x1a0   :  { %v425_v35 = vmul.f32 0.0015432099, %v416_v34 }
 0x1a1   :  { %v446_v36 = vpop.xlane.xlu1 %445 }
 0x1a2   :  { %v457_v37 = vmul.f32 %v425_v35, %v425_v35  ;;  %v455_v38 = vmul.f32 0.0015432099, %v446_v36 }
 0x1a3   :  { %v424_v39 = vpop.xlane.xlu0 %423 }
 0x1a4   :  { %v459_v40 = vsub.f32 %v455_v38, %v457_v37  ;;  %v426_v41 = vmul.f32 0.0015432099, %v424_v39 }
 0x1a5   :  { %v454_v42 = vpop.xlane.xlu1 %453 }
 0x1a6   :  { %v463_v43 = vadd.f32 1e-05, %v459_v40  ;;  %v458_v44 = vmul.f32 %v426_v41, %v426_v41  ;;  %v456_v45 = vmul.f32 0.0015432099, %v454_v42 }
 0x1a8   :  { %714 = vrsqrt.f32 %v463_v43  ;;  %v460_v46 = vsub.f32 %v456_v45, %v458_v44 }
 0x1aa   :  { %v464_v47 = vadd.f32 1e-05, %v460_v46 }
 0x1ac   :  { %716 = vrsqrt.f32 %v464_v47 }
 0x1b2   :  { %v715_v51 = vpop.eup %714 }
 0x1b3   :  { %v467_v53 = vmul.f32 %v715_v51, %v461_v49 }
 0x1b5   :  { %v469_v57 = vmul.f32 %v467_v53, %v425_v35 }
 0x1b6   :  { %v717_v59 = vpop.eup %716 }
 0x1b7   :  { %473 = vrot.lane.b32.xlu0 %v469_v57, %s720_s13  ;;  %v468_v61 = vmul.f32 %v717_v59, %v462_v54 }
 0x1b9   :  { %v470_v62 = vmul.f32 %v468_v61, %v426_v41 }
 0x1bb   :  { %475 = vrot.lane.b32.xlu1 %v470_v62, %s720_s13 }
 0x1bf   :  { %483 = vperm.xlu1 %650, %v467_v53  }
 0x1c3   :  { %488 = vperm.xlu1 %650, %v468_v61  }
 0x1c7   :  { %652 = vset.pattern.permute.xlu1 %v719_v48 }
 0x229   :  { %v474_v63 = vpop.permute.xlu0 %473 }
 0x22a   :  { %v479_v0 = vsub.f32 %v461_v49, %v474_v63 }
 0x22c   :  { %505 = vperm.xlu0 %651, %v479_v0  }
 0x22d   :  { %v476_v2 = vpop.permute.xlu1 %475 }
 0x22e   :  { %v480_v3 = vsub.f32 %v462_v54, %v476_v2 }
 0x230   :  { %510 = vperm.xlu1 %652, %v480_v3  }
 0x23e   :  { %v484_v5 = vpop.permute.xlu1 %483 }
 0x23f   :  { %v491_v7 = vmul.f32 %v484_v5, %v874_v50  ;;  %v492_v8 = vmul.f32 %v484_v5, %v878_v52  ;;  %v493_v9 = vmul.f32 %v484_v5, %v886_v56  ;;  %v494_v10 = vmul.f32 %v484_v5, %v894_v60 }
 0x240   :  { %v495_v11 = vmul.f32 %v484_v5, %v914_v14  ;;  %v496_v12 = vmul.f32 %v484_v5, %v918_v16 }
 0x242   :  { %v489_v6 = vpop.permute.xlu1 %488 }
 0x243   :  { %v497_v15 = vmul.f32 %v489_v6, %v884_v55  ;;  %v498_v17 = vmul.f32 %v489_v6, %v890_v58  ;;  %v499_v52 = vmul.f32 %v489_v6, %v901_v1  ;;  %v500_v56 = vmul.f32 %v489_v6, %v907_v4 }
 0x244   :  { %v501_v55 = vmul.f32 %v489_v6, %v921_v18  ;;  %v502_v58 = vmul.f32 %v489_v6, %v929_v22 }
 0x2ab   :  { %v506_v13 = vpop.permute.xlu0 %505 }
 0x2ac   :  { %v513_v19 = vadd.f32 %v506_v13, %v491_v7  ;;  %v514_v20 = vadd.f32 %v506_v13, %v492_v8  ;;  %v515_v21 = vadd.f32 %v506_v13, %v493_v9  ;;  %v516_v23 = vadd.f32 %v506_v13, %v494_v10 }
 0x2ad   :  { %v517_v50 = vadd.f32 %v506_v13, %v495_v11  ;;  %v518_v24 = vadd.f32 %v506_v13, %v496_v12 }
 0x2ae   :  { %v525_v60 = vmax.f32 %v513_v19, 0.0  ;;  %v526_v25 = vmax.f32 %v514_v20, 0.0  ;;  %v527_v14 = vmax.f32 %v515_v21, 0.0  ;;  %v528_v26 = vmax.f32 %v516_v23, 0.0 }
 0x2af   :  { %v529_v16 = vmax.f32 %v517_v50, 0.0  ;;  %v530_v27 = vmax.f32 %v518_v24, 0.0  ;;  %v511_v28 = vpop.permute.xlu1 %510 }
 0x2b0   :  { %v641_v1 = vpack.c.bf16 %v526_v25, %v525_v60  ;;  %v642_v30 = vpack.c.bf16 %v528_v26, %v527_v14  ;;  %v519_v4 = vadd.f32 %v511_v28, %v497_v15  ;;  %v520_v31 = vadd.f32 %v511_v28, %v498_v17 }
 0x2b1   :  { %v643_v32 = vpack.c.bf16 %v530_v27, %v529_v16  ;;  %v521_v33 = vadd.f32 %v511_v28, %v499_v52  ;;  %v522_v34 = vadd.f32 %v511_v28, %v500_v56  ;;  %v523_v35 = vadd.f32 %v511_v28, %v501_v55 }
 0x2b2   :  { %573 = vst [vmem:[%s987_s3] sm:$0xff] %v641_v1  ;;  %574 = vst [vmem:[%s987_s3 + $0x8] sm:$0xff] %v642_v30  ;;  %v524_v18 = vadd.f32 %v511_v28, %v502_v58  ;;  %v531_v22 = vmax.f32 %v519_v4, 0.0  ;;  %v532_v36 = vmax.f32 %v520_v31, 0.0 }
 0x2b3   :  { %578 = vst.msk [vmem:[%s987_s3 + $0x10] sm:$0xff] %vm958_vm5, %v643_v32  ;;  %v533_v37 = vmax.f32 %v521_v33, 0.0  ;;  %v534_v38 = vmax.f32 %v522_v34, 0.0  ;;  %v535_v39 = vmax.f32 %v523_v35, 0.0 }
 0x2b4   :  { %v536_v40 = vmax.f32 %v524_v18, 0.0  ;;  %v644_v41 = vpack.c.bf16 %v532_v36, %v531_v22 }
 0x2b5   :  { %v645_v42 = vpack.c.bf16 %v534_v38, %v533_v37 }
 0x2b6   :  { %v646_v43 = vpack.c.bf16 %v536_v40, %v535_v39  ;;  %579 = vst [vmem:[%s987_s3 + $0x18] sm:$0xff] %v644_v41 }
 0x2b7   :  { %580 = vst [vmem:[%s987_s3 + $0x20] sm:$0xff] %v645_v42 }
 0x2b8   :  { %581 = vst.msk [vmem:[%s987_s3 + $0x28] sm:$0xff] %vm958_vm5, %v646_v43 }

// kernel: dqn_forward.5
= control target key start
LH: loop header
LB: loop body
LE: loop exit
PB: predicated region body
PF: predicated region fallthrough
CT: control target
= control target key end

     0   :  { %v651_v0 = vmov 0   ;;  %vm261_vm0 = vcmask 130048   ;;  %vm366_vm1 = vcmask 801792   ;;  %s652_s28 = smov 1   ;;  %vm519_vm2 = vcmask 797696   ;;  %s846_s0 = inlined_call_operand.vmem [shape: bf16[400,98], index: 0, kind: input, shape index: {}]   ;;  %s847_s1 = inlined_call_operand.vmem [shape: bf16[32,400], index: 1, kind: input, shape index: {}]   ;;  %s848_s2 = inlined_call_operand.vmem [shape: f32[32,2], index: 2, kind: input, shape index: {}]   ;;  %s849_s3 = inlined_call_operand.vmem [shape: bf16[32,98], index: 3, kind: output, shape index: {}]  }
   0x1   :  { %317 = vmatprep.subr.bf16.mxu1 %v651_v0  ;;  %v606_v1 = vld [vmem:[%s846_s0 + $0x40] sm:$0xff]   ;;  %602 = vset.pattern.permute.xlu0 %v651_v0  ;;  %v609_v4 = vld [vmem:[%s846_s0 + $0x48] sm:$0xff]   ;;  %v612_v7 = vld [vmem:[%s846_s0 + $0x50] sm:$0xff]  }
   0x2   :  { %v607_v2 = vld [vmem:[%s846_s0 + $0x80] sm:$0xff]   ;;  %603 = vset.pattern.permute.xlu1 %v651_v0  ;;  %571 = vmatprep.subr.bf16.mxu0 %v606_v1  ;;  %v610_v5 = vld [vmem:[%s846_s0 + $0x88] sm:$0xff]   ;;  %v613_v8 = vld [vmem:[%s846_s0 + $0x90] sm:$0xff]  }
   0x3   :  { %v608_v3 = vld [vmem:[%s846_s0] sm:$0xff]   ;;  %318 = vmatpush1.bf16.msra.mxu1 %v607_v2  ;;  %v611_v6 = vld [vmem:[%s846_s0 + $0x8] sm:$0xff]   ;;  %v614_v9 = vld [vmem:[%s846_s0 + $0x10] sm:$0xff]  }
   0x4   :  { %572 = vmatpush3.bf16.msra.mxu0 %v608_v3  ;;  %319 = vmatprep.subr.bf16.mxu1 %v651_v0  ;;  %v615_v10 = vld [vmem:[%s846_s0 + $0x58] sm:$0xff]   ;;  %v618_v13 = vld [vmem:[%s846_s0 + $0x60] sm:$0xff]   ;;  %v621_v16 = vld [vmem:[%s846_s0 + $0x68] sm:$0xff]  }
   0x5   :  { %573 = vmatprep.subr.bf16.mxu0 %v609_v4  ;;  %v616_v11 = vld [vmem:[%s846_s0 + $0x98] sm:$0xff]   ;;  %v619_v14 = vld [vmem:[%s846_s0 + $0xa0] sm:$0xff]   ;;  %v622_v17 = vld [vmem:[%s846_s0 + $0xa8] sm:$0xff]  }
   0x6   :  { %v617_v12 = vld [vmem:[%s846_s0 + $0x18] sm:$0xff]   ;;  %v620_v15 = vld [vmem:[%s846_s0 + $0x20] sm:$0xff]   ;;  %v623_v18 = vld [vmem:[%s846_s0 + $0x28] sm:$0xff]  }
   0x7   :  { %320 = vmatpush1.bf16.msra.mxu1 %v610_v5  ;;  %v624_v19 = vld [vmem:[%s846_s0 + $0x70] sm:$0xff]   ;;  %v627_v22 = vld [vmem:[%s846_s0 + $0x78] sm:$0xff]   ;;  %v633_v28 = vld [vmem:[%s846_s0 + $0xc0] sm:$0xff]  }
   0x8   :  { %574 = vmatpush3.bf16.msra.mxu0 %v611_v6  ;;  %321 = vmatprep.subr.bf16.mxu1 %v651_v0  ;;  %v625_v20 = vld [vmem:[%s846_s0 + $0xb0] sm:$0xff]   ;;  %v628_v24 = vld [vmem:[%s846_s0 + $0xb8] sm:$0xff]  }
   0x9   :  { %575 = vmatprep.subr.bf16.mxu0 %v612_v7  ;;  %v626_v21 = vld [vmem:[%s846_s0 + $0x30] sm:$0xff]   ;;  %v636_v25 = vld [vmem:[%s847_s1 + $0xc] ss:$16 sps:$4 sm:$0xff]   ;;  %v634_v30 = vld [vmem:[%s847_s1 + $0x8] ss:$16 sps:$4 sm:$0xff]  }
   0xa   :  { %v632_v23 = vld [vmem:[%s847_s1 + $0x4] ss:$16 sps:$4 sm:$0xff]   ;;  %v629_v26 = vld [vmem:[%s846_s0 + $0x38] sm:$0xff]   ;;  %561 = vmatprep.mubr.msk.bf16.mxu1 %vm261_vm0, %v636_v25  ;;  %v630_v27 = vld [vmem:[%s847_s1] ss:$16 sps:$4 sm:$0xff]  }
   0xb   :  { %322 = vmatpush1.bf16.msra.mxu1 %v613_v8  ;;  %300 = vmatprep.mubr.bf16.mxu0 %v632_v23  ;;  %v637_v29 = vld [vmem:[%s847_s1 + $0x24] ss:$16 sps:$4 sm:$0xff]   ;;  %v640_v31 = vld [vmem:[%s847_s1 + $0x2c] ss:$16 sps:$4 sm:$0xff]   ;;  %v639_v32 = vld [vmem:[%s847_s1 + $0x20] ss:$16 sps:$4 sm:$0xff]  }
   0xc   :  { %576 = vmatpush3.bf16.msra.mxu0 %v614_v9  ;;  %323 = vmatprep.subr.bf16.mxu1 %v651_v0  ;;  %v642_v33 = vld [vmem:[%s847_s1 + $0x28] ss:$16 sps:$4 sm:$0xff]  }
   0xd   :  { %577 = vmatprep.subr.bf16.mxu0 %v615_v10 }
   0xf   :  { %324 = vmatpush1.bf16.msra.mxu1 %v616_v11 }
  0x10   :  { %578 = vmatpush3.bf16.msra.mxu0 %v617_v12  ;;  %325 = vmatprep.subr.bf16.mxu1 %v651_v0 }
  0x11   :  { %579 = vmatprep.subr.bf16.mxu0 %v618_v13 }
  0x13   :  { %326 = vmatpush1.bf16.msra.mxu1 %v619_v14 }
  0x14   :  { %580 = vmatpush3.bf16.msra.mxu0 %v620_v15  ;;  %327 = vmatprep.subr.bf16.mxu1 %v651_v0 }
  0x15   :  { %581 = vmatprep.subr.bf16.mxu0 %v621_v16 }
  0x17   :  { %328 = vmatpush1.bf16.msra.mxu1 %v622_v17 }
  0x18   :  { %582 = vmatpush3.bf16.msra.mxu0 %v623_v18  ;;  %329 = vmatprep.subr.bf16.mxu1 %v651_v0 }
  0x19   :  { %583 = vmatprep.subr.bf16.mxu0 %v624_v19 }
  0x1b   :  { %330 = vmatpush1.bf16.msra.mxu1 %v625_v20 }
  0x1c   :  { %584 = vmatpush3.bf16.msra.mxu0 %v626_v21  ;;  %331 = vmatprep.subr.bf16.mxu1 %v651_v0 }
  0x1d   :  { %585 = vmatprep.subr.bf16.mxu0 %v627_v22 }
  0x1f   :  { %332 = vmatpush1.bf16.msra.mxu1 %v628_v24 }
  0x20   :  { %586 = vmatpush3.bf16.msra.mxu0 %v629_v26  ;;  %333 = vmatprep.subr.bf16.mxu1 %v651_v0 }
  0x23   :  { %301 = vmatmul.mubr.bf16.vlgmr.msra.gmra.mrb[0].mxu0 %v630_v27  ;;  %334 = vmatpush1.bf16.msra.mxu1 %v633_v28 }
  0x24   :  { %308 = vmatprep.mubr.bf16.mxu0 %v637_v29 }
  0x26   :  { %350 = vmatmul.mubr.bf16.vlgmr.msra.gmra.mrb[0].mxu1 %v634_v30 }
  0x27   :  { %562 = vmatprep.mubr.msk.bf16.mxu1 %vm261_vm0, %v640_v31 }
  0x2b   :  { %309 = vmatmul.mubr.bf16.gmra.mrb[4].mxu0 %v639_v32 }
  0x2e   :  { %358 = vmatmul.mubr.bf16.gmra.mrb[4].mxu1 %v642_v33  ;;  %v412_v33 = vld [vmem:[%s848_s2 + $0x8] sm:$0xff] }
  0xf6   :  { %v587_v34 = vpop.f32.mrb[0].mxu0 }
  0xf7   :  { %v588_v35 = vpop.f32.mrb[1].mxu0 }
  0xf8   :  { %v589_v36 = vadd.f32 %v588_v35, %v587_v34  ;;  %v590_v37 = vpop.f32.mrb[2].mxu0 }
  0xf9   :  { %v591_v38 = vpop.f32.mrb[3].mxu0  ;;  %v351_v39 = vpop.f32.mrb[0].mxu1 }
  0xfa   :  { %v592_v40 = vadd.f32 %v591_v38, %v590_v37  ;;  %v786_v41 = vadd.f32 %v589_v36, %v351_v39  ;;  %v353_v42 = vpop.f32.mrb[1].mxu1  ;;  %v411_v36 = vld [vmem:[%s848_s2] sm:$0xff] }
  0xfb   :  { %v354_v43 = vpop.f32.mrb[2].mxu1  ;;  %v413_v42 = vld [vmem:[%s848_s2 + $0x10] sm:$0xff] }
  0xfc   :  { %v788_v44 = vadd.f32 %v592_v40, %v354_v43  ;;  %v356_v45 = vpop.f32.mrb[3].mxu1  ;;  %v367_v46 = vsel %vm366_vm1, %v786_v41, 0.0  ;;  %v383_v54 = vmul.f32 %v786_v41, %v786_v41 }
  0xfd   :  { %368 = vadd.xlane.f32.xlu0 %v367_v46 }
  0xfe   :  { %v593_v47 = vpop.f32.mrb[4].mxu0  ;;  %v384_v48 = vmul.f32 %v788_v44, %v788_v44  ;;  %v370_v53 = vsel %vm366_vm1, %v788_v44, 0.0  ;;  %v387_v0 = vsel %vm366_vm1, %v383_v54, 0.0 }
  0xff   :  { %v594_v49 = vpop.f32.mrb[5].mxu0 }
 0x100   :  { %v595_v50 = vadd.f32 %v594_v49, %v593_v47  ;;  %v596_v51 = vpop.f32.mrb[6].mxu0  ;;  %v390_v52 = vsel %vm366_vm1, %v384_v48, 0.0  ;;  %v414_v47 = vld [vmem:[%s848_s2 + $0x18] sm:$0xff] }
 0x101   :  { %v597_v55 = vpop.f32.mrb[7].mxu0  ;;  %v359_v56 = vpop.f32.mrb[4].mxu1  ;;  %391 = vadd.xlane.f32.xlu1 %v390_v52  ;;  %371 = vadd.xlane.f32.xlu0 %v370_v53  ;;  %v653_v52 = vmov 1  }
 0x102   :  { %v598_v57 = vadd.f32 %v597_v55, %v596_v51  ;;  %v799_v58 = vadd.f32 %v595_v50, %v359_v56  ;;  %v361_v59 = vpop.f32.mrb[5].mxu1 }
 0x103   :  { %v362_v60 = vpop.f32.mrb[6].mxu1 }
 0x104   :  { %v801_v61 = vadd.f32 %v598_v57, %v362_v60  ;;  %v364_v62 = vpop.f32.mrb[7].mxu1  ;;  %v373_v63 = vsel %vm366_vm1, %v799_v58, 0.0  ;;  %v385_v1 = vmul.f32 %v799_v58, %v799_v58 }
 0x105   :  { %374 = vadd.xlane.f32.xlu1 %v373_v63  ;;  %388 = vadd.xlane.f32.xlu0 %v387_v0 }
 0x106   :  { %v376_v2 = vsel %vm366_vm1, %v801_v61, 0.0  ;;  %v393_v3 = vsel %vm366_vm1, %v385_v1, 0.0  ;;  %v386_v4 = vmul.f32 %v801_v61, %v801_v61 }
 0x108   :  { %v396_v5 = vsel %vm366_vm1, %v386_v4, 0.0 }
 0x109   :  { %377 = vadd.xlane.f32.xlu1 %v376_v2  ;;  %394 = vadd.xlane.f32.xlu0 %v393_v3 }
 0x10d   :  { %397 = vadd.xlane.f32.xlu1 %v396_v5 }
 0x18a   :  { %v369_v6 = vpop.xlane.xlu0 %368 }
 0x18b   :  { %v379_v9 = vmul.f32 0.010204081, %v369_v6 }
 0x18d   :  { %v403_v15 = vmul.f32 %v379_v9, %v379_v9 }
 0x18e   :  { %v392_v7 = vpop.xlane.xlu1 %391  ;;  %v372_v8 = vpop.xlane.xlu0 %371 }
 0x18f   :  { %v380_v10 = vmul.f32 0.010204081, %v372_v8  ;;  %v400_v11 = vmul.f32 0.010204081, %v392_v7 }
 0x191   :  { %v404_v12 = vmul.f32 %v380_v10, %v380_v10 }
 0x192   :  { %v375_v13 = vpop.xlane.xlu1 %374  ;;  %v389_v14 = vpop.xlane.xlu0 %388 }
 0x193   :  { %v408_v16 = vsub.f32 %v400_v11, %v404_v12  ;;  %v381_v17 = vmul.f32 0.010204081, %v375_v13  ;;  %v399_v18 = vmul.f32 0.010204081, %v389_v14 }
 0x195   :  { %v416_v19 = vadd.f32 1e-05, %v408_v16  ;;  %v407_v20 = vsub.f32 %v399_v18, %v403_v15  ;;  %v405_v21 = vmul.f32 %v381_v17, %v381_v17 }
 0x196   :  { %v378_v22 = vpop.xlane.xlu1 %377  ;;  %v395_v23 = vpop.xlane.xlu0 %394 }
 0x197   :  { %643 = vrsqrt.f32 %v416_v19  ;;  %v415_v24 = vadd.f32 1e-05, %v407_v20  ;;  %v382_v25 = vmul.f32 0.010204081, %v378_v22  ;;  %v401_v26 = vmul.f32 0.010204081, %v395_v23 }
 0x199   :  { %645 = vrsqrt.f32 %v415_v24  ;;  %v409_v27 = vsub.f32 %v401_v26, %v405_v21  ;;  %v406_v29 = vmul.f32 %v382_v25, %v382_v25 }
 0x19a   :  { %v398_v28 = vpop.xlane.xlu1 %397 }
 0x19b   :  { %v417_v30 = vadd.f32 1e-05, %v409_v27  ;;  %v402_v31 = vmul.f32 0.010204081, %v398_v28 }
 0x19d   :  { %647 = vrsqrt.f32 %v417_v30  ;;  %v410_v32 = vsub.f32 %v402_v31, %v406_v29 }
 0x19f   :  { %v418_v34 = vadd.f32 1e-05, %v410_v32 }
 0x1a1   :  { %v644_v35 = vpop.eup %643  ;;  %649 = vrsqrt.f32 %v418_v34 }
 0x1a2   :  { %v424_v37 = vmul.f32 %v644_v35, %v412_v33 }
 0x1a3   :  { %v646_v38 = vpop.eup %645 }
 0x1a4   :  { %v428_v39 = vmul.f32 %v424_v37, %v380_v10  ;;  %v423_v40 = vmul.f32 %v646_v38, %v411_v36 }
 0x1a6   :  { %437 = vrot.lane.b32.xlu1 %v428_v39, %s652_s28  ;;  %v427_v43 = vmul.f32 %v423_v40, %v379_v9 }
 0x1a7   :  { %v648_v45 = vpop.eup %647 }
 0x1a8   :  { %435 = vrot.lane.b32.xlu0 %v427_v43, %s652_s28  ;;  %v425_v46 = vmul.f32 %v648_v45, %v413_v42 }
 0x1aa   :  { %v429_v48 = vmul.f32 %v425_v46, %v381_v17 }
 0x1ab   :  { %v650_v49 = vpop.eup %649 }
 0x1ac   :  { %453 = vperm.xlu0 %602, %v423_v40   ;;  %439 = vrot.lane.b32.xlu1 %v429_v48, %s652_s28  ;;  %v426_v50 = vmul.f32 %v650_v49, %v414_v47 }
 0x1ae   :  { %v430_v51 = vmul.f32 %v426_v50, %v382_v25 }
 0x1b0   :  { %468 = vperm.xlu0 %602, %v426_v50   ;;  %441 = vrot.lane.b32.xlu1 %v430_v51, %s652_s28 }
 0x1b4   :  { %458 = vperm.xlu1 %603, %v424_v37   ;;  %605 = vset.pattern.permute.xlu0 %v653_v52 }
 0x1b8   :  { %463 = vperm.xlu1 %603, %v425_v46  }
 0x1bc   :  { %604 = vset.pattern.permute.xlu1 %v653_v52 }
 0x218   :  { %v438_v53 = vpop.permute.xlu1 %437 }
 0x219   :  { %v448_v54 = vsub.f32 %v412_v33, %v438_v53 }
 0x21a   :  { %v436_v55 = vpop.permute.xlu0 %435 }
 0x21b   :  { %v447_v56 = vsub.f32 %v411_v36, %v436_v55  ;;  %482 = vperm.xlu0 %605, %v448_v54  }
 0x21d   :  { %477 = vperm.xlu1 %604, %v447_v56  }
 0x21e   :  { %v440_v57 = vpop.permute.xlu1 %439 }
 0x21f   :  { %v449_v59 = vsub.f32 %v413_v42, %v440_v57 }
 0x221   :  { %487 = vperm.xlu1 %604, %v449_v59  }
 0x222   :  { %v442_v60 = vpop.permute.xlu1 %441 }
 0x223   :  { %v450_v62 = vsub.f32 %v414_v47, %v442_v60 }
 0x225   :  { %492 = vperm.xlu1 %604, %v450_v62  }
 0x22b   :  { %v454_v63 = vpop.permute.xlu0 %453 }
 0x22c   :  { %v471_v5 = vmul.f32 %v454_v63, %v786_v41 }
 0x22f   :  { %v469_v1 = vpop.permute.xlu0 %468 }
 0x230   :  { %v474_v15 = vmul.f32 %v469_v1, %v801_v61 }
 0x233   :  { %v459_v0 = vpop.permute.xlu1 %458 }
 0x234   :  { %v472_v3 = vmul.f32 %v459_v0, %v788_v44 }
 0x237   :  { %v464_v2 = vpop.permute.xlu1 %463 }
 0x238   :  { %v473_v10 = vmul.f32 %v464_v2, %v799_v58 }
 0x29a   :  { %v483_v4 = vpop.permute.xlu0 %482 }
 0x29b   :  { %v496_v6 = vadd.f32 %v483_v4, %v472_v3 }
 0x29c   :  { %v478_v7 = vpop.permute.xlu1 %477 }
 0x29d   :  { %v500_v8 = vmax.f32 %v496_v6, 0.0  ;;  %v495_v9 = vadd.f32 %v478_v7, %v471_v5 }
 0x29f   :  { %v568_v11 = vpack.c.bf16 %v500_v8, %v500_v8  ;;  %v499_v12 = vmax.f32 %v495_v9, 0.0 }
 0x2a0   :  { %v488_v13 = vpop.permute.xlu1 %487 }
 0x2a1   :  { %521 = vst.msk [vmem:[%s849_s3 + $0x4] sm:$0xf] %vm519_vm2, %v568_v11  ;;  %v567_v14 = vpack.c.bf16 %v499_v12, %v499_v12  ;;  %v497_v44 = vadd.f32 %v488_v13, %v473_v10 }
 0x2a3   :  { %520 = vst.msk [vmem:[%s849_s3] sm:$0xf] %vm519_vm2, %v567_v14  ;;  %v501_v41 = vmax.f32 %v497_v44, 0.0 }
 0x2a4   :  { %v493_v16 = vpop.permute.xlu1 %492 }
 0x2a5   :  { %v569_v58 = vpack.c.bf16 %v501_v41, %v501_v41  ;;  %v498_v17 = vadd.f32 %v493_v16, %v474_v15 }
 0x2a7   :  { %522 = vst.msk [vmem:[%s849_s3 + $0x8] sm:$0xf] %vm519_vm2, %v569_v58  ;;  %v502_v18 = vmax.f32 %v498_v17, 0.0 }
 0x2a9   :  { %v570_v19 = vpack.c.bf16 %v502_v18, %v502_v18 }
 0x2ab   :  { %523 = vst.msk [vmem:[%s849_s3 + $0xc] sm:$0xf] %vm519_vm2, %v570_v19 }

// kernel: dqn_forward.6
= control target key start
LH: loop header
LB: loop body
LE: loop exit
PB: predicated region body
PF: predicated region fallthrough
CT: control target
= control target key end

     0   :  { %vm501_vm0 = vcmask 261120   ;;  %vm704_vm1 = vcmask 64512   ;;  %s1122_s9 = smov 1   ;;  %vm857_vm2 = vcmask 60416   ;;  %s1396_s0 = inlined_call_operand.vmem [shape: bf16[800,8], index: 0, kind: input, shape index: {}]   ;;  %s1397_s1 = inlined_call_operand.vmem [shape: bf16[32,800], index: 1, kind: input, shape index: {}]   ;;  %s1398_s2 = inlined_call_operand.vmem [shape: f32[32,2], index: 2, kind: input, shape index: {}]   ;;  %s1399_s3 = inlined_call_operand.vmem [shape: bf16[32,8], index: 3, kind: output, shape index: {}]  }
   0x1   :  { %v1043_v0 = vld [vmem:[%s1396_s0 + $0x40] sm:$0xff]   ;;  %v1047_v4 = vld [vmem:[%s1396_s0 + $0x48] sm:$0xff]   ;;  %v1051_v8 = vld [vmem:[%s1396_s0 + $0x50] sm:$0xff]  }
   0x2   :  { %v1044_v1 = vld [vmem:[%s1396_s0 + $0xc0] sm:$0xff]   ;;  %940 = vmatprep.subr.bf16.mxu0 %v1043_v0  ;;  %v1048_v5 = vld [vmem:[%s1396_s0 + $0xc8] sm:$0xff]   ;;  %v1052_v9 = vld [vmem:[%s1396_s0 + $0xd0] sm:$0xff]  }
   0x3   :  { %v1045_v2 = vld [vmem:[%s1396_s0] sm:$0xff]   ;;  %968 = vmatprep.subr.bf16.mxu1 %v1044_v1  ;;  %v1049_v6 = vld [vmem:[%s1396_s0 + $0x8] sm:$0xff]   ;;  %v1053_v10 = vld [vmem:[%s1396_s0 + $0x10] sm:$0xff]  }
   0x4   :  { %v1046_v3 = vld [vmem:[%s1396_s0 + $0x80] sm:$0xff]   ;;  %941 = vmatpush3.bf16.msra.mxu0 %v1045_v2  ;;  %v1050_v7 = vld [vmem:[%s1396_s0 + $0x88] sm:$0xff]   ;;  %v1054_v11 = vld [vmem:[%s1396_s0 + $0x90] sm:$0xff]  }
   0x5   :  { %969 = vmatpush3.bf16.msra.mxu1 %v1046_v3  ;;  %942 = vmatprep.subr.bf16.mxu0 %v1047_v4  ;;  %v1055_v12 = vld [vmem:[%s1396_s0 + $0x58] sm:$0xff]   ;;  %v1059_v16 = vld [vmem:[%s1396_s0 + $0x60] sm:$0xff]   ;;  %v1063_v20 = vld [vmem:[%s1396_s0 + $0x68] sm:$0xff]  }
   0x6   :  { %970 = vmatprep.subr.bf16.mxu1 %v1048_v5  ;;  %v1056_v13 = vld [vmem:[%s1396_s0 + $0xd8] sm:$0xff]   ;;  %v1060_v17 = vld [vmem:[%s1396_s0 + $0xe0] sm:$0xff]   ;;  %v1064_v21 = vld [vmem:[%s1396_s0 + $0xe8] sm:$0xff]  }
   0x7   :  { %v1057_v14 = vld [vmem:[%s1396_s0 + $0x18] sm:$0xff]   ;;  %v1061_v18 = vld [vmem:[%s1396_s0 + $0x20] sm:$0xff]   ;;  %v1065_v22 = vld [vmem:[%s1396_s0 + $0x28] sm:$0xff]  }
   0x8   :  { %943 = vmatpush3.bf16.msra.mxu0 %v1049_v6  ;;  %v1058_v15 = vld [vmem:[%s1396_s0 + $0x98] sm:$0xff]   ;;  %v1062_v19 = vld [vmem:[%s1396_s0 + $0xa0] sm:$0xff]   ;;  %v1066_v23 = vld [vmem:[%s1396_s0 + $0xa8] sm:$0xff]  }
   0x9   :  { %971 = vmatpush3.bf16.msra.mxu1 %v1050_v7  ;;  %944 = vmatprep.subr.bf16.mxu0 %v1051_v8  ;;  %v1067_v24 = vld [vmem:[%s1396_s0 + $0x70] sm:$0xff]   ;;  %v1071_v28 = vld [vmem:[%s1396_s0 + $0x78] sm:$0xff]   ;;  %v1077_v33 = vld [vmem:[%s1397_s1 + $0x4] ss:$28 sps:$4 sm:$0xff]  }
   0xa   :  { %972 = vmatprep.subr.bf16.mxu1 %v1052_v9  ;;  %v1068_v25 = vld [vmem:[%s1396_s0 + $0xf0] sm:$0xff]   ;;  %v1072_v29 = vld [vmem:[%s1396_s0 + $0xf8] sm:$0xff]   ;;  %v1078_v34 = vld [vmem:[%s1397_s1 + $0x8] ss:$28 sps:$4 sm:$0xff]   ;;  %540 = vmatprep.mubr.bf16.mxu0 %v1077_v33 }
   0xb   :  { %v1069_v26 = vld [vmem:[%s1396_s0 + $0x30] sm:$0xff]   ;;  %v1073_v30 = vld [vmem:[%s1396_s0 + $0x38] sm:$0xff]   ;;  %v1080_v35 = vld [vmem:[%s1397_s1 + $0xc] ss:$28 sps:$4 sm:$0xff]  }
   0xc   :  { %945 = vmatpush3.bf16.msra.mxu0 %v1053_v10  ;;  %v1070_v27 = vld [vmem:[%s1396_s0 + $0xb0] sm:$0xff]   ;;  %v1074_v31 = vld [vmem:[%s1396_s0 + $0xb8] sm:$0xff]   ;;  %v1081_v36 = vld [vmem:[%s1396_s0 + $0x140] sm:$0xff]   ;;  %589 = vmatprep.mubr.bf16.mxu1 %v1080_v35 }
   0xd   :  { %973 = vmatpush3.bf16.msra.mxu1 %v1054_v11  ;;  %946 = vmatprep.subr.bf16.mxu0 %v1055_v12  ;;  %v1075_v32 = vld [vmem:[%s1397_s1] ss:$28 sps:$4 sm:$0xff]   ;;  %v1083_v38 = vld [vmem:[%s1396_s0 + $0x148] sm:$0xff]   ;;  %v1085_v40 = vld [vmem:[%s1396_s0 + $0x150] sm:$0xff]  }
   0xe   :  { %974 = vmatprep.subr.bf16.mxu1 %v1056_v13  ;;  %v1082_v37 = vld [vmem:[%s1396_s0 + $0x100] sm:$0xff]   ;;  %v1084_v39 = vld [vmem:[%s1396_s0 + $0x108] sm:$0xff]   ;;  %v1086_v41 = vld [vmem:[%s1396_s0 + $0x110] sm:$0xff]  }
   0xf   :  { %v1087_v42 = vld [vmem:[%s1396_s0 + $0x158] sm:$0xff]   ;;  %v1089_v44 = vld [vmem:[%s1396_s0 + $0x160] sm:$0xff]   ;;  %v1096_v51 = vld [vmem:[%s1396_s0 + $0x168] sm:$0xff]  }
  0x10   :  { %947 = vmatpush3.bf16.msra.mxu0 %v1057_v14  ;;  %v1088_v43 = vld [vmem:[%s1396_s0 + $0x118] sm:$0xff]   ;;  %v1091_v45 = vld [vmem:[%s1396_s0 + $0x180] sm:$0xff]   ;;  %v1102_v52 = vld [vmem:[%s1396_s0 + $0x188] sm:$0xff]  }
  0x11   :  { %975 = vmatpush3.bf16.msra.mxu1 %v1058_v15  ;;  %948 = vmatprep.subr.bf16.mxu0 %v1059_v16  ;;  %v1092_v46 = vld [vmem:[%s1397_s1 + $0x3c] ss:$28 sps:$4 sm:$0xff]   ;;  %v1094_v47 = vld [vmem:[%s1397_s1 + $0x44] ss:$28 sps:$4 sm:$0xff]   ;;  %v1099_v53 = vld [vmem:[%s1396_s0 + $0x128] sm:$0xff]  }
  0x12   :  { %976 = vmatprep.subr.bf16.mxu1 %v1060_v17  ;;  %v1097_v48 = vld [vmem:[%s1397_s1 + $0x38] ss:$28 sps:$4 sm:$0xff]   ;;  %v1098_v49 = vld [vmem:[%s1397_s1 + $0x40] ss:$28 sps:$4 sm:$0xff]   ;;  %v1109_v58 = vld [vmem:[%s1397_s1 + $0x50] ss:$28 sps:$4 sm:$0xff]  }
  0x13   :  { %v1090_v50 = vld [vmem:[%s1396_s0 + $0x120] sm:$0xff]   ;;  %v1100_v54 = vld [vmem:[%s1396_s0 + $0x170] sm:$0xff]   ;;  %v1103_v59 = vld [vmem:[%s1396_s0 + $0x178] sm:$0xff]  }
  0x14   :  { %949 = vmatpush3.bf16.msra.mxu0 %v1061_v18  ;;  %v1101_v55 = vld [vmem:[%s1396_s0 + $0x130] sm:$0xff]   ;;  %v1104_v60 = vld [vmem:[%s1396_s0 + $0x138] sm:$0xff]   ;;  %v1110_v62 = vld [vmem:[%s1397_s1 + $0x4c] ss:$28 sps:$4 sm:$0xff]  }
  0x15   :  { %977 = vmatpush3.bf16.msra.mxu1 %v1062_v19  ;;  %950 = vmatprep.subr.bf16.mxu0 %v1063_v20  ;;  %v1107_v56 = vld [vmem:[%s1397_s1 + $0x14] ss:$28 sps:$4 sm:$0xff]   ;;  %v1112_v63 = vld [vmem:[%s1397_s1 + $0x48] ss:$28 sps:$4 sm:$0xff]  }
  0x16   :  { %978 = vmatprep.subr.bf16.mxu1 %v1064_v21  ;;  %v1108_v57 = vld [vmem:[%s1397_s1 + $0x18] ss:$28 sps:$4 sm:$0xff]   ;;  %v1105_v61 = vld [vmem:[%s1397_s1 + $0x10] ss:$28 sps:$4 sm:$0xff]  }
  0x18   :  { %951 = vmatpush3.bf16.msra.mxu0 %v1065_v22 }
  0x19   :  { %979 = vmatpush3.bf16.msra.mxu1 %v1066_v23  ;;  %952 = vmatprep.subr.bf16.mxu0 %v1067_v24 }
  0x1a   :  { %980 = vmatprep.subr.bf16.mxu1 %v1068_v25 }
  0x1c   :  { %953 = vmatpush3.bf16.msra.mxu0 %v1069_v26 }
  0x1d   :  { %981 = vmatpush3.bf16.msra.mxu1 %v1070_v27  ;;  %954 = vmatprep.subr.bf16.mxu0 %v1071_v28 }
  0x1e   :  { %982 = vmatprep.subr.bf16.mxu1 %v1072_v29 }
  0x20   :  { %955 = vmatpush3.bf16.msra.mxu0 %v1073_v30 }
  0x21   :  { %983 = vmatpush3.bf16.msra.mxu1 %v1074_v31  ;;  %996 = vmatprep.subr.bf16.mxu0 %v1081_v36 }
  0x22   :  { %1028 = vmatprep.subr.bf16.mxu1 %v1091_v45 }
  0x23   :  { %541 = vmatmul.mubr.bf16.vlgmr.msra.gmra.mrb[0].mxu0 %v1075_v32 }
  0x24   :  { %590 = vmatmul.mubr.bf16.vlgmr.msra.gmra.mrb[0].mxu1 %v1078_v34  ;;  %997 = vmatpush3.bf16.msra.mxu0 %v1082_v37 }
  0x25   :  { %998 = vmatprep.subr.bf16.mxu0 %v1083_v38  ;;  %548 = vmatprep.mubr.bf16.mxu0 %v1092_v46 }
  0x26   :  { %1029 = vmatpush3.bf16.msra.mxu1 %v1091_v45  ;;  %597 = vmatprep.mubr.bf16.mxu1 %v1094_v47 }
  0x27   :  { %1030 = vmatprep.subr.bf16.mxu1 %v1102_v52 }
  0x28   :  { %999 = vmatpush3.bf16.msra.mxu0 %v1084_v39 }
  0x29   :  { %1000 = vmatprep.subr.bf16.mxu0 %v1085_v40 }
  0x2a   :  { %1031 = vmatpush3.bf16.msra.mxu1 %v1102_v52 }
  0x2b   :  { %549 = vmatmul.mubr.bf16.gmra.mrb[4].mxu0 %v1097_v48 }
  0x2c   :  { %1001 = vmatpush3.bf16.msra.mxu0 %v1086_v41  ;;  %598 = vmatmul.mubr.bf16.gmra.mrb[4].mxu1 %v1098_v49 }
  0x2d   :  { %1002 = vmatprep.subr.bf16.mxu0 %v1087_v42  ;;  %638 = vmatprep.mubr.bf16.mxu0 %v1107_v56 }
  0x2e   :  { %1032 = vmatprep.mubr.msk.bf16.mxu1 %vm501_vm0, %v1108_v57 }
  0x30   :  { %1003 = vmatpush3.bf16.msra.mxu0 %v1088_v43 }
  0x31   :  { %1004 = vmatprep.subr.bf16.mxu0 %v1089_v44 }
  0x34   :  { %1005 = vmatpush3.bf16.msra.mxu0 %v1090_v50  ;;  %1033 = vmatmul.mubr.msk.bf16.vlgmr.msra.gmra.mrb[8].mxu1 %vm501_vm0, %v1109_v58 }
  0x35   :  { %1006 = vmatprep.subr.bf16.mxu0 %v1096_v51 }
  0x38   :  { %1007 = vmatpush3.bf16.msra.mxu0 %v1099_v53 }
  0x39   :  { %1008 = vmatprep.subr.bf16.mxu0 %v1100_v54 }
  0x3c   :  { %1009 = vmatpush3.bf16.msra.mxu0 %v1101_v55 }
  0x3d   :  { %1010 = vmatprep.subr.bf16.mxu0 %v1103_v59 }
  0x40   :  { %1011 = vmatpush3.bf16.msra.mxu0 %v1104_v60 }
  0x43   :  { %639 = vmatmul.mubr.bf16.vlgmr.msra.gmra.mrb[8].mxu0 %v1105_v61 }
  0x44   :  { %646 = vmatprep.mubr.bf16.mxu0 %v1110_v62 }
  0x4b   :  { %647 = vmatmul.mubr.bf16.gmra.mrb[12].mxu0 %v1112_v63 }
  0xf6   :  { %v956_v0 = vpop.f32.mrb[0].mxu0 }
  0xf7   :  { %v984_v1 = vpop.f32.mrb[0].mxu1  ;;  %v957_v2 = vpop.f32.mrb[1].mxu0 }
  0xf8   :  { %v958_v3 = vadd.f32 %v957_v2, %v956_v0  ;;  %v985_v4 = vpop.f32.mrb[1].mxu1  ;;  %v959_v5 = vpop.f32.mrb[2].mxu0  ;;  %v1121_v0 = vmov 0  }
  0xf9   :  { %v986_v6 = vadd.f32 %v985_v4, %v984_v1  ;;  %v987_v7 = vpop.f32.mrb[2].mxu1  ;;  %v960_v8 = vpop.f32.mrb[3].mxu0  ;;  %1039 = vset.pattern.permute.xlu0 %v1121_v0  ;;  %1040 = vset.pattern.permute.xlu1 %v1121_v0 }
  0xfa   :  { %v961_v9 = vadd.f32 %v960_v8, %v959_v5  ;;  %v988_v10 = vpop.f32.mrb[3].mxu1 }
  0xfb   :  { %v592_v11 = vadd.f32 %v986_v6, %v958_v3  ;;  %v989_v12 = vadd.f32 %v988_v10, %v987_v7 }
  0xfd   :  { %v595_v13 = vadd.f32 %v989_v12, %v961_v9 }
  0xfe   :  { %v962_v14 = vpop.f32.mrb[4].mxu0 }
  0xff   :  { %v990_v15 = vpop.f32.mrb[4].mxu1  ;;  %v963_v16 = vpop.f32.mrb[5].mxu0 }
 0x100   :  { %v964_v17 = vadd.f32 %v963_v16, %v962_v14  ;;  %v991_v18 = vpop.f32.mrb[5].mxu1  ;;  %v965_v19 = vpop.f32.mrb[6].mxu0 }
 0x101   :  { %v992_v20 = vadd.f32 %v991_v18, %v990_v15  ;;  %v993_v21 = vpop.f32.mrb[6].mxu1  ;;  %v966_v22 = vpop.f32.mrb[7].mxu0 }
 0x102   :  { %v967_v23 = vadd.f32 %v966_v22, %v965_v19  ;;  %v994_v24 = vpop.f32.mrb[7].mxu1 }
 0x103   :  { %v600_v25 = vadd.f32 %v992_v20, %v964_v17  ;;  %v995_v26 = vadd.f32 %v994_v24, %v993_v21 }
 0x105   :  { %v603_v27 = vadd.f32 %v995_v26, %v967_v23 }
 0x107   :  { %v1034_v28 = vpop.f32.mrb[8].mxu1 }
 0x108   :  { %v689_v29 = vpop.f32.mrb[9].mxu1 }
 0x109   :  { %v1035_v30 = vpop.f32.mrb[10].mxu1 }
 0x10a   :  { %v692_v31 = vpop.f32.mrb[11].mxu1 }
 0x116   :  { %v1012_v32 = vpop.f32.mrb[8].mxu0 }
 0x117   :  { %v1013_v33 = vpop.f32.mrb[9].mxu0 }
 0x118   :  { %v1014_v34 = vadd.f32 %v1013_v33, %v1012_v32  ;;  %v1015_v35 = vpop.f32.mrb[10].mxu0 }
 0x119   :  { %v1016_v36 = vpop.f32.mrb[11].mxu0 }
 0x11a   :  { %v641_v37 = vadd.f32 %v1014_v34, %v592_v11  ;;  %v1017_v38 = vadd.f32 %v1016_v36, %v1015_v35  ;;  %v751_v36 = vld [vmem:[%s1398_s2 + $0x10] sm:$0xff] }
 0x11c   :  { %v1336_v39 = vadd.f32 %v689_v29, %v641_v37  ;;  %v644_v40 = vadd.f32 %v1017_v38, %v595_v13 }
 0x11e   :  { %v1338_v41 = vadd.f32 %v692_v31, %v644_v40  ;;  %v1018_v42 = vpop.f32.mrb[12].mxu0  ;;  %v705_v43 = vsel %vm704_vm1, %v1336_v39, 0.0  ;;  %v721_v49 = vmul.f32 %v1336_v39, %v1336_v39  ;;  %v749_v31 = vld [vmem:[%s1398_s2] sm:$0xff] }
 0x11f   :  { %v1019_v44 = vpop.f32.mrb[13].mxu0  ;;  %706 = vadd.xlane.f32.xlu0 %v705_v43 }
 0x120   :  { %v1020_v45 = vadd.f32 %v1019_v44, %v1018_v42  ;;  %v1021_v46 = vpop.f32.mrb[14].mxu0  ;;  %v722_v47 = vmul.f32 %v1338_v41, %v1338_v41  ;;  %v708_v53 = vsel %vm704_vm1, %v1338_v41, 0.0  ;;  %v725_v58 = vsel %vm704_vm1, %v721_v49, 0.0  ;;  %v752_v42 = vld [vmem:[%s1398_s2 + $0x18] sm:$0xff] }
 0x121   :  { %v1022_v48 = vpop.f32.mrb[15].mxu0 }
 0x122   :  { %v649_v50 = vadd.f32 %v1020_v45, %v600_v25  ;;  %v1023_v51 = vadd.f32 %v1022_v48, %v1021_v46  ;;  %v728_v52 = vsel %vm704_vm1, %v722_v47, 0.0  ;;  %v1123_v47 = vmov 1  }
 0x123   :  { %729 = vadd.xlane.f32.xlu1 %v728_v52  ;;  %709 = vadd.xlane.f32.xlu0 %v708_v53 }
 0x124   :  { %v1349_v54 = vadd.f32 %v1034_v28, %v649_v50  ;;  %v652_v55 = vadd.f32 %v1023_v51, %v603_v27  ;;  %v750_v28 = vld [vmem:[%s1398_s2 + $0x8] sm:$0xff] }
 0x126   :  { %v1351_v56 = vadd.f32 %v1035_v30, %v652_v55  ;;  %v711_v57 = vsel %vm704_vm1, %v1349_v54, 0.0  ;;  %v723_v59 = vmul.f32 %v1349_v54, %v1349_v54 }
 0x127   :  { %712 = vadd.xlane.f32.xlu1 %v711_v57  ;;  %726 = vadd.xlane.f32.xlu0 %v725_v58 }
 0x128   :  { %v714_v60 = vsel %vm704_vm1, %v1351_v56, 0.0  ;;  %v731_v61 = vsel %vm704_vm1, %v723_v59, 0.0  ;;  %v724_v62 = vmul.f32 %v1351_v56, %v1351_v56 }
 0x12a   :  { %v734_v63 = vsel %vm704_vm1, %v724_v62, 0.0 }
 0x12b   :  { %715 = vadd.xlane.f32.xlu1 %v714_v60  ;;  %732 = vadd.xlane.f32.xlu0 %v731_v61 }
 0x12f   :  { %735 = vadd.xlane.f32.xlu1 %v734_v63 }
 0x1ac   :  { %v707_v1 = vpop.xlane.xlu0 %706 }
 0x1ad   :  { %v717_v4 = vmul.f32 0.125, %v707_v1 }
 0x1af   :  { %v741_v10 = vmul.f32 %v717_v4, %v717_v4 }
 0x1b0   :  { %v730_v2 = vpop.xlane.xlu1 %729  ;;  %v710_v3 = vpop.xlane.xlu0 %709 }
 0x1b1   :  { %v718_v5 = vmul.f32 0.125, %v710_v3  ;;  %v738_v6 = vmul.f32 0.125, %v730_v2 }
 0x1b3   :  { %v742_v7 = vmul.f32 %v718_v5, %v718_v5 }
 0x1b4   :  { %v713_v8 = vpop.xlane.xlu1 %712  ;;  %v727_v9 = vpop.xlane.xlu0 %726 }
 0x1b5   :  { %v746_v11 = vsub.f32 %v738_v6, %v742_v7  ;;  %v719_v12 = vmul.f32 0.125, %v713_v8  ;;  %v737_v13 = vmul.f32 0.125, %v727_v9 }
 0x1b7   :  { %v754_v14 = vadd.f32 1e-05, %v746_v11  ;;  %v745_v15 = vsub.f32 %v737_v13, %v741_v10  ;;  %v743_v16 = vmul.f32 %v719_v12, %v719_v12 }
 0x1b8   :  { %v716_v17 = vpop.xlane.xlu1 %715  ;;  %v733_v18 = vpop.xlane.xlu0 %732 }
 0x1b9   :  { %1113 = vrsqrt.f32 %v754_v14  ;;  %v753_v19 = vadd.f32 1e-05, %v745_v15  ;;  %v720_v20 = vmul.f32 0.125, %v716_v17  ;;  %v739_v21 = vmul.f32 0.125, %v733_v18 }
 0x1bb   :  { %1115 = vrsqrt.f32 %v753_v19  ;;  %v747_v22 = vsub.f32 %v739_v21, %v743_v16  ;;  %v744_v24 = vmul.f32 %v720_v20, %v720_v20 }
 0x1bc   :  { %v736_v23 = vpop.xlane.xlu1 %735 }
 0x1bd   :  { %v755_v25 = vadd.f32 1e-05, %v747_v22  ;;  %v740_v26 = vmul.f32 0.125, %v736_v23 }
 0x1bf   :  { %1117 = vrsqrt.f32 %v755_v25  ;;  %v748_v27 = vsub.f32 %v740_v26, %v744_v24 }
 0x1c1   :  { %v756_v29 = vadd.f32 1e-05, %v748_v27 }
 0x1c3   :  { %v1114_v30 = vpop.eup %1113  ;;  %1119 = vrsqrt.f32 %v756_v29 }
 0x1c4   :  { %v762_v32 = vmul.f32 %v1114_v30, %v750_v28 }
 0x1c5   :  { %v1116_v33 = vpop.eup %1115 }
 0x1c6   :  { %v766_v34 = vmul.f32 %v762_v32, %v718_v5  ;;  %v761_v35 = vmul.f32 %v1116_v33, %v749_v31 }
 0x1c8   :  { %775 = vrot.lane.b32.xlu1 %v766_v34, %s1122_s9  ;;  %v765_v37 = vmul.f32 %v761_v35, %v717_v4 }
 0x1c9   :  { %v1118_v38 = vpop.eup %1117 }
 0x1ca   :  { %773 = vrot.lane.b32.xlu0 %v765_v37, %s1122_s9  ;;  %v763_v40 = vmul.f32 %v1118_v38, %v751_v36 }
 0x1cc   :  { %v767_v43 = vmul.f32 %v763_v40, %v719_v12 }
 0x1cd   :  { %v1120_v44 = vpop.eup %1119 }
 0x1ce   :  { %791 = vperm.xlu0 %1039, %v761_v35   ;;  %777 = vrot.lane.b32.xlu1 %v767_v43, %s1122_s9  ;;  %v764_v45 = vmul.f32 %v1120_v44, %v752_v42 }
 0x1d0   :  { %v768_v46 = vmul.f32 %v764_v45, %v720_v20 }
 0x1d2   :  { %806 = vperm.xlu0 %1039, %v764_v45   ;;  %779 = vrot.lane.b32.xlu1 %v768_v46, %s1122_s9 }
 0x1d6   :  { %796 = vperm.xlu1 %1040, %v762_v32   ;;  %1042 = vset.pattern.permute.xlu0 %v1123_v47 }
 0x1da   :  { %801 = vperm.xlu1 %1040, %v763_v40  }
 0x1de   :  { %1041 = vset.pattern.permute.xlu1 %v1123_v47 }
 0x23a   :  { %v776_v48 = vpop.permute.xlu1 %775 }
 0x23b   :  { %v786_v49 = vsub.f32 %v750_v28, %v776_v48 }
 0x23c   :  { %v774_v50 = vpop.permute.xlu0 %773 }
 0x23d   :  { %v785_v51 = vsub.f32 %v749_v31, %v774_v50  ;;  %820 = vperm.xlu0 %1042, %v786_v49  }
 0x23f   :  { %815 = vperm.xlu1 %1041, %v785_v51  }
 0x240   :  { %v778_v52 = vpop.permute.xlu1 %777 }
 0x241   :  { %v787_v53 = vsub.f32 %v751_v36, %v778_v52 }
 0x243   :  { %825 = vperm.xlu1 %1041, %v787_v53  }
 0x244   :  { %v780_v55 = vpop.permute.xlu1 %779 }
 0x245   :  { %v788_v57 = vsub.f32 %v752_v42, %v780_v55 }
 0x247   :  { %830 = vperm.xlu1 %1041, %v788_v57  }
 0x24d   :  { %v792_v58 = vpop.permute.xlu0 %791 }
 0x24e   :  { %v809_v0 = vmul.f32 %v792_v58, %v1336_v39 }
 0x251   :  { %v807_v60 = vpop.permute.xlu0 %806 }
 0x252   :  { %v812_v10 = vmul.f32 %v807_v60, %v1351_v56 }
 0x255   :  { %v797_v59 = vpop.permute.xlu1 %796 }
 0x256   :  { %v810_v62 = vmul.f32 %v797_v59, %v1338_v41 }
 0x259   :  { %v802_v61 = vpop.permute.xlu1 %801 }
 0x25a   :  { %v811_v5 = vmul.f32 %v802_v61, %v1349_v54 }
 0x2bc   :  { %v821_v63 = vpop.permute.xlu0 %820 }
 0x2bd   :  { %v834_v1 = vadd.f32 %v821_v63, %v810_v62 }
 0x2be   :  { %v816_v2 = vpop.permute.xlu1 %815 }
 0x2bf   :  { %v838_v3 = vmax.f32 %v834_v1, 0.0  ;;  %v833_v4 = vadd.f32 %v816_v2, %v809_v0 }
 0x2c1   :  { %v937_v6 = vpack.c.bf16 %v838_v3, %v838_v3  ;;  %v837_v7 = vmax.f32 %v833_v4, 0.0 }
 0x2c2   :  { %v826_v8 = vpop.permute.xlu1 %825 }
 0x2c3   :  { %859 = vst.msk [vmem:[%s1399_s3 + $0x4] sm:$0xf] %vm857_vm2, %v937_v6  ;;  %v936_v9 = vpack.c.bf16 %v837_v7, %v837_v7  ;;  %v835_v41 = vadd.f32 %v826_v8, %v811_v5 }
 0x2c5   :  { %858 = vst.msk [vmem:[%s1399_s3] sm:$0xf] %vm857_vm2, %v936_v9  ;;  %v839_v39 = vmax.f32 %v835_v41, 0.0 }
 0x2c6   :  { %v831_v11 = vpop.permute.xlu1 %830 }
 0x2c7   :  { %v938_v54 = vpack.c.bf16 %v839_v39, %v839_v39  ;;  %v836_v12 = vadd.f32 %v831_v11, %v812_v10 }
 0x2c9   :  { %860 = vst.msk [vmem:[%s1399_s3 + $0x8] sm:$0xf] %vm857_vm2, %v938_v54  ;;  %v840_v13 = vmax.f32 %v836_v12, 0.0 }
 0x2cb   :  { %v939_v14 = vpack.c.bf16 %v840_v13, %v840_v13 }
 0x2cd   :  { %861 = vst.msk [vmem:[%s1399_s3 + $0xc] sm:$0xf] %vm857_vm2, %v939_v14 }

// kernel: dqn_forward.7
= control target key start
LH: loop header
LB: loop body
LE: loop exit
PB: predicated region body
PF: predicated region fallthrough
CT: control target
= control target key end

     0   :  { %v217_v1 = vmov 0.0   ;;  %vm218_vm0 = vmmov 0   ;;  %s282_s0 = inlined_call_operand.vmem [shape: bf16[2,128], index: 0, kind: input, shape index: {}]   ;;  %s283_s1 = inlined_call_operand.vmem [shape: bf16[128,4], index: 1, kind: input, shape index: {}]   ;;  %s284_s2 = inlined_call_operand.vmem [shape: f32[1,4], index: 2, kind: input, shape index: {}]   ;;  %s285_s3 = inlined_call_operand.hbm [shape: f32[2,4], index: 3, kind: output, shape index: {}]  }
   0x1   :  { %v185_v0 = vld [vmem:[%s283_s1] sm:$0xff]   ;;  %162 = vmatprep.subr.bf16.mxu0 %v217_v1  ;;  %v186_v2 = vld [vmem:[%s283_s1 + $0x8] sm:$0xff]   ;;  %178 = vmatprep.mubr.msk.bf16.mxu0 %vm218_vm0, %v217_v1  ;;  %v187_v3 = vld [vmem:[%s283_s1 + $0x10] sm:$0xff]  }
   0x2   :  { %163 = vmatpush3.bf16.msra.mxu0 %v185_v0 }
   0x3   :  { %164 = vmatprep.subr.bf16.mxu0 %v217_v1 }
   0x6   :  { %165 = vmatpush3.bf16.msra.mxu0 %v186_v2 }
   0x7   :  { %166 = vmatprep.subr.bf16.mxu0 %v217_v1 }
   0x8   :  { %8 = vsyncpa [#allocation3], 0  ;;  %v188_v4 = vld [vmem:[%s283_s1 + $0x18] sm:$0xff]   ;;  %v189_v5 = vld [vmem:[%s283_s1 + $0x20] sm:$0xff]   ;;  %s219_s5 = smov [#allocation2]   ;;  %vm128_vm1 = vcmask 25600  }
   0x9   :  { %v190_v6 = vld [vmem:[%s283_s1 + $0x28] sm:$0xff]   ;;  %v191_v7 = vld [vmem:[%s283_s1 + $0x30] sm:$0xff]   ;;  %v192_v8 = vld [vmem:[%s283_s1 + $0x38] sm:$0xff]   ;;  %s136_s6 = sshll.u32 %s219_s5, 4  ;;  %s137_s6 = int_to_ptr.vmem [resolvable:$true] %s136_s6 }
   0xa   :  { %167 = vmatpush3.bf16.msra.mxu0 %v187_v3  ;;  %v16_v9 = vld [vmem:[%s282_s0] sm:$0x1]  ;;  %s193_s1 = scalar_lea.vmem %s137_s6, 32  ;;  %p198_p1 = scmp.lt.s32.totalorder %s137_s6, %s137_s6 }
   0xb   :  { %168 = vmatprep.subr.bf16.mxu0 %v217_v1  ;;  %v144_v10 = vld [vmem:[%s284_s2] ss:$0 sm:$0xff]  ;;  %p194_p0 = scmp.ne.s32.totalorder %s137_s6, %s193_s1  ;;  %p199_p2 = scmp.lt.s32.totalorder %s193_s1, %s193_s1 }
   0xd   :  { %p200_p3 = por %p199_p2, %p198_p1 }
   0xe   :  { %169 = vmatpush3.bf16.msra.mxu0 %v188_v4 }
   0xf   :  { %170 = vmatprep.subr.bf16.mxu0 %v217_v1  ;;  %p201_p4 = pnand %p200_p3, %p194_p0 }
  0x12   :  { %171 = vmatpush3.bf16.msra.mxu0 %v189_v5 }
  0x13   :  { %172 = vmatprep.subr.bf16.mxu0 %v217_v1 }
  0x16   :  { %173 = vmatpush3.bf16.msra.mxu0 %v190_v6 }
  0x17   :  { %174 = vmatprep.subr.bf16.mxu0 %v217_v1 }
  0x1a   :  { %175 = vmatpush3.bf16.msra.mxu0 %v191_v7 }
  0x1b   :  { %176 = vmatprep.subr.bf16.mxu0 %v217_v1 }
  0x1e   :  { %177 = vmatpush3.bf16.msra.mxu0 %v192_v8 }
  0x21   :  { %179 = vmatmul.mubr.bf16.vlgmr.msra.gmra.mrb[0].mxu0 %v16_v9 }
  0xf4   :  { %v122_v11 = vpop.f32.mrb[0].mxu0 }
  0xf5   :  { %v123_v12 = vadd.f32 %v144_v10, %v122_v11  ;;  %v180_v13 = vpop.f32.mrb[1].mxu0 }
  0xf6   :  { %v125_v14 = vpop.f32.mrb[2].mxu0 }
  0xf7   :  { %v181_v15 = vpop.f32.mrb[3].mxu0  ;;  %129 = vst.msk [vmem:[#allocation2] sm:$0x3] %vm128_vm1, %v123_v12 }
  0xf8   :  { %204 = shalt.err (!%p201_p4)
}
  0xf9   :  { %s205_s2 = scalar_lea.hbm %s285_s3, 32 }
  0xfa   :  { %p206_p5 = scmp.ne.s32.totalorder %s285_s3, %s205_s2  ;;  %p209_p6 = scmp.lt.u32.totalorder %s205_s2, %s285_s3 }
  0xfc   :  { %p211_p7 = pnand %p209_p6, %p206_p5 }
  0xfe   :  { %214 = shalt.err (!%p211_p7)
}
  0xff   :  { %139 = dma.vmem_to_hbm [thread:$0]  %s137_s6, 32, %s285_s3, [#allocation3]  }
 0x100   :  { %215 = dma.done.wait [#allocation3], 32  }
 0x101   :  { %216 = vsyncadd [#allocation3], 4294967264 }
 0x102   :  { %143 = vsyncpa [#allocation3], 1 }

</bundles_post_ra>
